<compile_context>
chip_gen: v7x
topology: tpu7x:2x2x1
jax: 0.10.0
libtpu: 0.0.40
codegen_flags: <defaults>
</compile_context>

<pallas_src>
import functools

import jax
import jax.numpy as jnp
import numpy as np
from jax.experimental import pallas as pl
from jax.experimental.pallas import tpu as pltpu

EPS = 1e-5


def _round_up(x, m):
  return (x + m - 1) // m * m


def _cdiv(a, b):
  return -(-a // b)


def _const_spec(shape):
  """Full-array VMEM block with a constant index map (weights / params)."""
  n = len(shape)
  return pl.BlockSpec(shape, lambda i: (0,) * n)


def _dot(a, b):
  return jnp.dot(a, b, preferred_element_type=jnp.float32)


def _ln_last(x, g, b):
  """nn.LayerNorm over the last axis with affine params g, b (broadcastable)."""
  m = jnp.mean(x, axis=-1, keepdims=True)
  v = jnp.mean((x - m) ** 2, axis=-1, keepdims=True)
  return (x - m) * jax.lax.rsqrt(v + EPS) * g + b


def _build_feature_embedding(x_num_ref, wnum_ref, bnum_ref, cat_idx_ref,
                             cat_tab_ref, stats_ref, *, num_cols, cat_cols):
  """Lane-dense (tb, C*H) globally layer-normed feature embedding.

  Numerical columns: one (tb, nc) @ (nc, nc*H) block-diagonal matmul + ReLU.
  Categorical columns: one-hot @ table MXU matmuls (the in-kernel "gather").
  Global-LN stats (over the whole batch) arrive via stats_ref as
  [[mean_num, rstd_num, mean_cat, rstd_cat, ...]].
  """
  parts = []
  if num_cols > 0:
    raw = _dot(x_num_ref[...], wnum_ref[...]) + bnum_ref[...]
    raw = jnp.maximum(raw, 0.0)
    parts.append((raw - stats_ref[:, 0:1]) * stats_ref[:, 1:2])
  if cat_cols > 0:
    tb = cat_idx_ref.shape[0]
    max_cat = cat_tab_ref.shape[1]
    cat_parts = []
    for i in range(cat_cols):
      iota = jax.lax.broadcasted_iota(jnp.int32, (tb, max_cat), 1)
      onehot = (iota == cat_idx_ref[:, i:i + 1]).astype(jnp.float32)
      cat_parts.append(_dot(onehot, cat_tab_ref[i]))     # gather via the MXU
    cat = cat_parts[0] if cat_cols == 1 else jnp.concatenate(cat_parts, axis=1)
    parts.append((cat - stats_ref[:, 2:3]) * stats_ref[:, 3:4])
  return parts[0] if len(parts) == 1 else jnp.concatenate(parts, axis=1)


def _learner_kernel(*refs, num_cols, cat_cols):
  """All L feature-importance learners fused into lane-dense MXU matmuls."""
  it = iter(refs)
  x_num_ref = next(it) if num_cols > 0 else None
  wnum_ref = next(it) if num_cols > 0 else None
  bnum_ref = next(it) if num_cols > 0 else None
  cat_idx_ref = next(it) if cat_cols > 0 else None
  cat_tab_ref = next(it) if cat_cols > 0 else None
  stats_ref = next(it)
  w1_ref = next(it)
  b1_ref = next(it)
  lnw_ref = next(it)
  lnb_ref = next(it)
  mavg_ref = next(it)
  mexp_ref = next(it)
  w2_ref = next(it)
  b2_ref = next(it)
  fi_out_ref = next(it)

  fe = _build_feature_embedding(x_num_ref, wnum_ref, bnum_ref, cat_idx_ref,
                                cat_tab_ref, stats_ref,
                                num_cols=num_cols, cat_cols=cat_cols)
  # One matmul for all (learner, column) groups: (tb, C*H) @ (C*H, L*C*H).
  h = _dot(fe, w1_ref[...]) + b1_ref[...]
  h = jnp.maximum(h, 0.0)
  # Per-(learner, column) LayerNorm over H via reduce / broadcast matmuls.
  mean_g = _dot(h, mavg_ref[...])                     # (tb, L*C)
  sq_g = _dot(h * h, mavg_ref[...])                   # (tb, L*C)
  var_g = jnp.maximum(sq_g - mean_g * mean_g, 0.0)
  rstd_g = jax.lax.rsqrt(var_g + EPS)
  mean_b = _dot(mean_g, mexp_ref[...])                # (tb, L*C*H)
  rstd_b = _dot(rstd_g, mexp_ref[...])                # (tb, L*C*H)
  h = (h - mean_b) * rstd_b * lnw_ref[...] + lnb_ref[...]
  # Dropout(p=0.5) is eval-mode identity.
  # TODO(synk): training-mode dropout (random mask) not implemented.
  # Per-group Linear(H, 1) for every learner at once -> (tb, L*C) raw scores
  # already in torch's feature_importance.reshape(B, L*C) layout.
  fi_out_ref[...] = _dot(h, w2_ref[...]) + b2_ref[...]


def _head_kernel(*refs, num_cols, cat_cols, num_learner, hidden):
  """Importance mixing, weighted embedding, fake_GNN and prediction head."""
  it = iter(refs)
  x_num_ref = next(it) if num_cols > 0 else None
  wnum_ref = next(it) if num_cols > 0 else None
  bnum_ref = next(it) if num_cols > 0 else None
  cat_idx_ref = next(it) if cat_cols > 0 else None
  cat_tab_ref = next(it) if cat_cols > 0 else None
  fi_raw_ref = next(it)
  stats_ref = next(it)
  fiw_w_ref = next(it)
  fiw_b_ref = next(it)
  fiw_lnw_ref = next(it)
  fiw_lnb_ref = next(it)
  mexpc_ref = next(it)
  w_comb_ref = next(it)
  gnn_b_ref = next(it)
  pw1_gnn_ref = next(it)
  pb1_ref = next(it)
  p_lnw_ref = next(it)
  p_lnb_ref = next(it)
  pw2_ref = next(it)
  pb2_ref = next(it)
  out_ref = next(it)

  ncols = num_cols + cat_cols

  # ---- global layer_norm of the stacked importance scores (host stats) ----
  fi_n = (fi_raw_ref[...] - stats_ref[:, 4:5]) * stats_ref[:, 5:6]  # (tb, L*C)

  # ---- learner mixing: Linear(C*L, L) -> ReLU -> LN(L) -> softmax ----------
  logits = _dot(fi_n, fiw_w_ref[...]) + fiw_b_ref[...]
  logits = jnp.maximum(logits, 0.0)
  logits = _ln_last(logits, fiw_lnw_ref[...], fiw_lnb_ref[...])
  logits = logits - jnp.max(logits, axis=-1, keepdims=True)
  ew = jnp.exp(logits)
  wl = ew / jnp.sum(ew, axis=-1, keepdims=True)       # exact softmax

  # ---- weighted sum over learners -> per-column importance (tb, C) ---------
  fi_w = fi_n[:, 0:ncols] * wl[:, 0:1]
  for l in range(1, num_learner):
    fi_w = fi_w + fi_n[:, l * ncols:(l + 1) * ncols] * wl[:, l:l + 1]

  # ---- importance-weighted embedding, fake_GNN, head (K-fold pre-summed) ---
  fe = _build_feature_embedding(x_num_ref, wnum_ref, bnum_ref, cat_idx_ref,
                                cat_tab_ref, stats_ref,
                                num_cols=num_cols, cat_cols=cat_cols)
  fi_w_b = _dot(fi_w, mexpc_ref[...])                 # broadcast C -> C*H lanes
  few = fe * fi_w_b                                   # (tb, C*H)
  # One matmul for fake_GNN and the "few" half of the prediction layer.
  z = _dot(few, w_comb_ref[...])                      # (tb, 2H)
  gnn = z[:, :hidden] + gnn_b_ref[...]                # fake_GNN output
  # concat([gnn]*K + [few]) @ pw1 == gnn @ sum(first K blocks) + few @ rest.
  h = _dot(gnn, pw1_gnn_ref[...]) + z[:, hidden:] + pb1_ref[...]
  h = jnp.maximum(h, 0.0)
  h = _ln_last(h, p_lnw_ref[...], p_lnb_ref[...])
  out_ref[...] = _dot(h, pw2_ref[...]) + pb2_ref[...]


class KGraphMultiNoGraphPallas:
  """JAX/Pallas re-implementation of K_graph_Multi_noGraph (eval mode)."""

  def __init__(self, num_cols, cat_cols, label_cols, cat_num, hidden_dim=32,
               K_ratio=0.6, num_learner=2, seed=0, max_batch_tile=2048):
    assert num_cols + cat_cols > 0
    self.num_cols = num_cols
    self.cat_cols = cat_cols
    self.label_cols = label_cols
    self.hidden_dim = hidden_dim
    self.num_learner = num_learner
    self.C = num_cols + cat_cols
    self.K = round(self.C * K_ratio)
    self.max_batch_tile = max(8, _round_up(max_batch_tile, 8))

    H, C, L, K = hidden_dim, self.C, num_learner, self.K
    nc, cc = num_cols, cat_cols
    G = L * C

    key = jax.random.PRNGKey(seed)
    keys = iter(jax.random.split(key, 64))

    def nrm(shape, scale=0.1):
      return scale * jax.random.normal(next(keys), shape, jnp.float32)

    # ---- raw parameters (mirroring the torch module structure) -------------
    self.w_num = nrm((nc, H)) if nc > 0 else None        # per-col Linear(1, H)
    self.b_num = nrm((nc, H), 0.01) if nc > 0 else None
    self.cat_tables = [nrm((cat_num[i], H), 1.0) for i in range(cc)]
    self.lw1 = nrm((L, H, H))                            # learner Linear(H,H)
    self.lb1 = nrm((L, H), 0.01)
    self.lln_w = jnp.ones((L, H), jnp.float32)
    self.lln_b = jnp.zeros((L, H), jnp.float32)
    self.lw2 = nrm((L, H))                               # learner Linear(H,1)
    self.lb2 = nrm((L,), 0.01)
    self.fiw_w = nrm((C * L, L))                         # Linear(C*L, L)
    self.fiw_b = nrm((1, L), 0.01)
    self.fiw_lnw = jnp.ones((1, L), jnp.float32)
    self.fiw_lnb = jnp.zeros((1, L), jnp.float32)
    self.gnn_w = nrm((C * H, H))                         # fake_GNN Linear(C*H,H)
    self.gnn_b = nrm((1, H), 0.01)
    pw1 = nrm(((K + C) * H, H))                          # head Linear((K+C)*H,H)
    if K > 0:
      self.pw1_gnn = pw1[:K * H].reshape(K, H, H).sum(axis=0)   # exact K-fold
    else:
      self.pw1_gnn = jnp.zeros((H, H), jnp.float32)
    self.pw1_few = pw1[K * H:]                           # (C*H, H)
    self.pb1 = nrm((1, H), 0.01)
    self.p_lnw = jnp.ones((1, H), jnp.float32)
    self.p_lnb = jnp.zeros((1, H), jnp.float32)
    self.pw2 = nrm((H, label_cols + 1))
    self.pb2 = nrm((1, label_cols + 1), 0.01)

    # ---- kernel-side fused / lane-dense weight layouts ----------------------
    if nc > 0:
      # (B, nc) @ (nc, nc*H): block-diag expansion of the per-col Linear(1,H).
      self.wnum_big = (jnp.eye(nc, dtype=jnp.float32)[:, :, None]
                       * self.w_num[None, :, :]).reshape(nc, nc * H)
      self.bnum_big = self.b_num.reshape(1, nc * H)
    if cc > 0:
      max_cat = _round_up(max(cat_num), 8)
      self.cat_tab = jnp.stack(
          [jnp.pad(self.cat_tables[i], ((0, max_cat - cat_num[i]), (0, 0)))
           for i in range(cc)], axis=0)                  # (cc, max_cat, H)
      # Per-row stats -> cheap host-side global-LN statistics for the cat
      # embedding (no (B, cc, H) materialization).
      self.cat_row_mean = jnp.mean(self.cat_tab, axis=2)
      self.cat_row_sq = jnp.mean(self.cat_tab ** 2, axis=2)

    # Learners fused over (learner, column) groups.
    w1_big = jnp.zeros((C * H, G * H), jnp.float32)
    w2_big = jnp.zeros((G * H, G), jnp.float32)
    for l in range(L):
      for c in range(C):
        g = l * C + c
        w1_big = w1_big.at[c * H:(c + 1) * H, g * H:(g + 1) * H].set(self.lw1[l])
        w2_big = w2_big.at[g * H:(g + 1) * H, g].set(self.lw2[l])
    self.w1_big = w1_big
    self.w2_big = w2_big
    self.b1_big = jnp.concatenate(
        [jnp.tile(self.lb1[l], C) for l in range(L)]).reshape(1, G * H)
    self.lnw_big = jnp.concatenate(
        [jnp.tile(self.lln_w[l], C) for l in range(L)]).reshape(1, G * H)
    self.lnb_big = jnp.concatenate(
        [jnp.tile(self.lln_b[l], C) for l in range(L)]).reshape(1, G * H)
    self.b2_big = jnp.repeat(self.lb2, C).reshape(1, G)
    # Per-(learner,column) LayerNorm reduce/broadcast and the C -> C*H
    # importance broadcast expressed as MXU matmuls (the MXU is idle anyway).
    self.mavg = jnp.kron(jnp.eye(G, dtype=jnp.float32),
                         jnp.ones((H, 1), jnp.float32) / H)        # (G*H, G)
    self.mexp = jnp.kron(jnp.eye(G, dtype=jnp.float32),
                         jnp.ones((1, H), jnp.float32))            # (G, G*H)
    self.mexpc = jnp.kron(jnp.eye(C, dtype=jnp.float32),
                          jnp.ones((1, H), jnp.float32))           # (C, C*H)
    # Fused fake_GNN + prediction-head few-part weight: (C*H, 2H).
    self.w_comb = jnp.concatenate([self.gnn_w, self.pw1_few], axis=1)

    self._forward = jax.jit(self._forward_impl)

  def __call__(self, input_data):
    return self._forward(input_data)

  def _forward_impl(self, input_data):
    B = input_data.shape[0]
    nc, cc = self.num_cols, self.cat_cols
    H, C, L = self.hidden_dim, self.C, self.num_learner
    G = L * C
    x = jnp.asarray(input_data, jnp.float32)

    zero = jnp.float32(0.0)
    one = jnp.float32(1.0)

    # -- batch-global layer_norm statistics (two-pass scheme; cheap) ----------
    if nc > 0:
      x_num = x[:, :nc]
      raw = jnp.maximum(
          x_num[:, :, None] * self.w_num[None, :, :] + self.b_num[None, :, :],
          0.0)
      m_n = jnp.mean(raw)
      r_n = jax.lax.rsqrt(jnp.mean((raw - m_n) ** 2) + EPS)
    else:
      m_n, r_n = zero, one
    if cc > 0:
      cat_idx = x[:, nc:nc + cc].astype(jnp.int32)
      gm = jnp.stack([jnp.take(self.cat_row_mean[i], cat_idx[:, i], axis=0)
                      for i in range(cc)], axis=1)        # (B, cc)
      gs = jnp.stack([jnp.take(self.cat_row_sq[i], cat_idx[:, i], axis=0)
                      for i in range(cc)], axis=1)
      m_c = jnp.mean(gm)
      r_c = jax.lax.rsqrt(jnp.maximum(jnp.mean(gs) - m_c * m_c, 0.0) + EPS)
    else:
      m_c, r_c = zero, one

    # -- batch tiling (grid over batch; both v7x TensorCores when B >= 16) ----
    nb = _cdiv(B, self.max_batch_tile)
    if B >= 16:
      nb = max(nb, 2)
    tb = _round_up(_cdiv(B, nb), 8)
    nb = _cdiv(B, tb)
    b_pad = nb * tb
    pad = b_pad - B

    args1, specs1 = [], []
    if nc > 0:
      x_num_p = jnp.pad(x_num, ((0, pad), (0, 0)))
      args1 += [x_num_p, self.wnum_big, self.bnum_big]
      specs1 += [pl.BlockSpec((tb, nc), lambda i: (i, 0)),
                 _const_spec(self.wnum_big.shape),
                 _const_spec(self.bnum_big.shape)]
    if cc > 0:
      cat_idx_p = jnp.pad(cat_idx, ((0, pad), (0, 0)))
      args1 += [cat_idx_p, self.cat_tab]
      specs1 += [pl.BlockSpec((tb, cc), lambda i: (i, 0)),
                 _const_spec(self.cat_tab.shape)]

    stats1 = jnp.stack([m_n, r_n, m_c, r_c]).astype(jnp.float32).reshape(1, 4)
    learner_consts = [stats1, self.w1_big, self.b1_big, self.lnw_big,
                      self.lnb_big, self.mavg, self.mexp, self.w2_big,
                      self.b2_big]
    args1 += learner_consts
    specs1 += [_const_spec(a.shape) for a in learner_consts]

    grid = (nb,)
    cparams = pltpu.CompilerParams(dimension_semantics=("parallel",),
                                   vmem_limit_bytes=32 * 1024 * 1024)

    # -- kernel 1: fused feature-importance learners -> raw (B, L*C) scores --
    fi_raw = pl.pallas_call(
        functools.partial(_learner_kernel, num_cols=nc, cat_cols=cc),
        grid=grid,
        in_specs=specs1,
        out_specs=pl.BlockSpec((tb, G), lambda i: (i, 0)),
        out_shape=jax.ShapeDtypeStruct((b_pad, G), jnp.float32),
        compiler_params=cparams,
    )(*args1)

    # -- global LN stats of the stacked importance scores (valid rows only) --
    fi_valid = fi_raw[:B]
    m_f = jnp.mean(fi_valid)
    r_f = jax.lax.rsqrt(jnp.mean((fi_valid - m_f) ** 2) + EPS)
    stats2 = jnp.stack([m_n, r_n, m_c, r_c, m_f, r_f]
                       ).astype(jnp.float32).reshape(1, 6)

    # -- kernel 2: mixing softmax, weighted embedding, fake_GNN, head --------
    args2, specs2 = [], []
    if nc > 0:
      args2 += [x_num_p, self.wnum_big, self.bnum_big]
      specs2 += [pl.BlockSpec((tb, nc), lambda i: (i, 0)),
                 _const_spec(self.wnum_big.shape),
                 _const_spec(self.bnum_big.shape)]
    if cc > 0:
      args2 += [cat_idx_p, self.cat_tab]
      specs2 += [pl.BlockSpec((tb, cc), lambda i: (i, 0)),
                 _const_spec(self.cat_tab.shape)]
    args2 += [fi_raw]
    specs2 += [pl.BlockSpec((tb, G), lambda i: (i, 0))]
    head_consts = [stats2, self.fiw_w, self.fiw_b, self.fiw_lnw, self.fiw_lnb,
                   self.mexpc, self.w_comb, self.gnn_b, self.pw1_gnn, self.pb1,
                   self.p_lnw, self.p_lnb, self.pw2, self.pb2]
    args2 += head_consts
    specs2 += [_const_spec(a.shape) for a in head_consts]

    out = pl.pallas_call(
        functools.partial(_head_kernel, num_cols=nc, cat_cols=cc,
                          num_learner=L, hidden=H),
        grid=grid,
        in_specs=specs2,
        out_specs=pl.BlockSpec((tb, self.label_cols + 1), lambda i: (i, 0)),
        out_shape=jax.ShapeDtypeStruct((b_pad, self.label_cols + 1),
                                       jnp.float32),
        compiler_params=cparams,
    )(*args2)
    return out[:B]


def reference_forward(model, input_data):
  """Pure-JAX reference of K_graph_Multi_noGraph.forward (eval mode).

  The original top-K / scatter / nonzero graph section reduces exactly to
  'fake_GNN output tiled K times per sample', and the K-tiled head matmul is
  folded (exactly, by linearity) into pw1_gnn = sum of the first K H-blocks
  of the head weight.
  """
  x = jnp.asarray(input_data, jnp.float32)
  B = x.shape[0]
  H, C, L = model.hidden_dim, model.C, model.num_learner
  nc, cc = model.num_cols, model.cat_cols

  def gln(t):
    m = jnp.mean(t)
    v = jnp.mean((t - m) ** 2)
    return (t - m) * jax.lax.rsqrt(v + EPS)

  parts = []
  if nc > 0:
    fe_num = jnp.maximum(
        x[:, :nc, None] * model.w_num[None, :, :] + model.b_num[None, :, :],
        0.0)
    parts.append(gln(fe_num))                             # (B, nc, H)
  if cc > 0:
    idx = x[:, nc:nc + cc].astype(jnp.int32)
    fe_cat = jnp.stack([model.cat_tables[i][idx[:, i]] for i in range(cc)],
                       axis=1)                            # (B, cc, H)
    parts.append(gln(fe_cat))
  fe = jnp.concatenate(parts, axis=1)                     # (B, C, H)

  fis = []
  for l in range(L):
    h = jnp.einsum("bch,hd->bcd", fe, model.lw1[l]) + model.lb1[l]
    h = jnp.maximum(h, 0.0)
    m = jnp.mean(h, -1, keepdims=True)
    v = jnp.mean((h - m) ** 2, -1, keepdims=True)
    h = (h - m) * jax.lax.rsqrt(v + EPS) * model.lln_w[l] + model.lln_b[l]
    fis.append(jnp.einsum("bch,h->bc", h, model.lw2[l]) + model.lb2[l])
  fi = gln(jnp.stack(fis, axis=1))                        # (B, L, C)

  logits = jnp.dot(fi.reshape(B, L * C), model.fiw_w) + model.fiw_b
  logits = jnp.maximum(logits, 0.0)
  m = jnp.mean(logits, -1, keepdims=True)
  v = jnp.mean((logits - m) ** 2, -1, keepdims=True)
  logits = (logits - m) * jax.lax.rsqrt(v + EPS) * model.fiw_lnw + model.fiw_lnb
  w = jax.nn.softmax(logits, axis=1)                      # (B, L)
  fi_mix = jnp.sum(fi * w[:, :, None], axis=1)            # (B, C)

  few = (fe * fi_mix[:, :, None]).reshape(B, C * H)
  gnn = jnp.dot(few, model.gnn_w) + model.gnn_b
  h = (jnp.dot(gnn, model.pw1_gnn) + jnp.dot(few, model.pw1_few) + model.pb1)
  h = jnp.maximum(h, 0.0)
  m = jnp.mean(h, -1, keepdims=True)
  v = jnp.mean((h - m) ** 2, -1, keepdims=True)
  h = (h - m) * jax.lax.rsqrt(v + EPS) * model.p_lnw + model.p_lnb
  return jnp.dot(h, model.pw2) + model.pb2


if __name__ == "__main__":
  # Small shapes consistent with the module: 3 numerical columns, 2
  # categorical columns, 1 label column, hidden_dim=32, num_learner=2,
  # K_ratio=0.6 (K=3), batch=8.
  NUM = ["n0", "n1", "n2"]
  CAT = ["c0", "c1"]
  LABEL = ["y0"]
  cat_num = [7, 11]
  B = 8

  model = KGraphMultiNoGraphPallas(
      num_cols=len(NUM), cat_cols=len(CAT), label_cols=len(LABEL),
      cat_num=cat_num, hidden_dim=32, K_ratio=0.6, num_learner=2, seed=0,
      max_batch_tile=2048)

  key = jax.random.PRNGKey(0)
  k_num, k_cat = jax.random.split(key)
  num_part = jax.random.normal(k_num, (B, len(NUM)), jnp.float32)
  cat_part = jnp.stack(
      [jax.random.randint(jax.random.fold_in(k_cat, i), (B,), 0, cat_num[i])
       for i in range(len(CAT))], axis=1).astype(jnp.float32)
  input_data = jnp.concatenate([num_part, cat_part], axis=1)   # (B, 5)

  out = jax.block_until_ready(model(input_data))
  assert out.shape == (B, len(LABEL) + 1), out.shape

  # Numerical self-check against a pure-JAX reference with the same weights.
  # All kernel math is float32; the tolerance only has to cover accumulation
  # order and XLA's default matmul precision on the reference side.
  ref = jax.block_until_ready(reference_forward(model, input_data))
  np.testing.assert_allclose(np.asarray(out), np.asarray(ref),
                             rtol=1e-2, atol=1e-2)

  print("KERNEL_OK")
</pallas_src>

<mosaic_0001>
module attributes {stable_mosaic.version = 11 : i64} {
  func.func @_learner_kernel(%arg0: i32, %arg1: memref<8x3xf32, #tpu.memory_space<vmem>>, %arg2: memref<3x96xf32, #tpu.memory_space<vmem>>, %arg3: memref<1x96xf32, #tpu.memory_space<vmem>>, %arg4: memref<8x2xi32, #tpu.memory_space<vmem>>, %arg5: memref<2x16x32xf32, #tpu.memory_space<vmem>>, %arg6: memref<1x4xf32, #tpu.memory_space<vmem>>, %arg7: memref<160x320xf32, #tpu.memory_space<vmem>>, %arg8: memref<1x320xf32, #tpu.memory_space<vmem>>, %arg9: memref<1x320xf32, #tpu.memory_space<vmem>>, %arg10: memref<1x320xf32, #tpu.memory_space<vmem>>, %arg11: memref<320x10xf32, #tpu.memory_space<vmem>>, %arg12: memref<10x320xf32, #tpu.memory_space<vmem>>, %arg13: memref<320x10xf32, #tpu.memory_space<vmem>>, %arg14: memref<1x10xf32, #tpu.memory_space<vmem>>, %arg15: memref<8x10xf32, #tpu.memory_space<vmem>>) attributes {dimension_semantics = [#tpu.dimension_semantics<parallel>], iteration_bounds = array<i64: 1>, scalar_prefetch = 0 : i64, scratch_operands = 0 : i64, tpu.core_type = #tpu.core_type<tc>, window_params = [{transform_indices = @transform_0, window_bounds = array<i64: 8, 3>}, {pipeline_mode = #tpu.pipeline_mode<synchronous>, transform_indices = @transform_1, window_bounds = array<i64: 3, 96>}, {pipeline_mode = #tpu.pipeline_mode<synchronous>, transform_indices = @transform_2, window_bounds = array<i64: 1, 96>}, {transform_indices = @transform_3, window_bounds = array<i64: 8, 2>}, {pipeline_mode = #tpu.pipeline_mode<synchronous>, transform_indices = @transform_4, window_bounds = array<i64: 2, 16, 32>}, {pipeline_mode = #tpu.pipeline_mode<synchronous>, transform_indices = @transform_5, window_bounds = array<i64: 1, 4>}, {pipeline_mode = #tpu.pipeline_mode<synchronous>, transform_indices = @transform_6, window_bounds = array<i64: 160, 320>}, {pipeline_mode = #tpu.pipeline_mode<synchronous>, transform_indices = @transform_7, window_bounds = array<i64: 1, 320>}, {pipeline_mode = #tpu.pipeline_mode<synchronous>, transform_indices = @transform_8, window_bounds = array<i64: 1, 320>}, {pipeline_mode = #tpu.pipeline_mode<synchronous>, transform_indices = @transform_9, window_bounds = array<i64: 1, 320>}, {pipeline_mode = #tpu.pipeline_mode<synchronous>, transform_indices = @transform_10, window_bounds = array<i64: 320, 10>}, {pipeline_mode = #tpu.pipeline_mode<synchronous>, transform_indices = @transform_11, window_bounds = array<i64: 10, 320>}, {pipeline_mode = #tpu.pipeline_mode<synchronous>, transform_indices = @transform_12, window_bounds = array<i64: 320, 10>}, {pipeline_mode = #tpu.pipeline_mode<synchronous>, transform_indices = @transform_13, window_bounds = array<i64: 1, 10>}, {transform_indices = @transform_14, window_bounds = array<i64: 8, 10>}]} {
    %c0 = arith.constant 0 : index
    %c0_0 = arith.constant 0 : index
    %0 = vector.load %arg1[%c0, %c0_0] : memref<8x3xf32, #tpu.memory_space<vmem>>, vector<8x3xf32>
    %c0_1 = arith.constant 0 : index
    %c0_2 = arith.constant 0 : index
    %1 = vector.load %arg2[%c0_1, %c0_2] : memref<3x96xf32, #tpu.memory_space<vmem>>, vector<3x96xf32>
    %cst = arith.constant dense<0.000000e+00> : vector<8x96xf32>
    %2 = tpu.matmul %0, %1, %cst {dimension_numbers = #tpu.dot_dimension_numbers<[1], [0], [0], [1], [0, 0, 1, 1], [], []>} : vector<8x3xf32>, vector<3x96xf32>, vector<8x96xf32> -> vector<8x96xf32>
    %c0_3 = arith.constant 0 : index
    %c0_4 = arith.constant 0 : index
    %3 = vector.load %arg3[%c0_3, %c0_4] : memref<1x96xf32, #tpu.memory_space<vmem>>, vector<1x96xf32>
    %4 = vector.broadcast %3 : vector<1x96xf32> to vector<8x96xf32>
    %5 = arith.addf %2, %4 : vector<8x96xf32>
    %cst_5 = arith.constant 0.000000e+00 : f32
    %6 = vector.broadcast %cst_5 : f32 to vector<8x96xf32>
    %7 = arith.maximumf %5, %6 : vector<8x96xf32>
    %c0_6 = arith.constant 0 : index
    %c0_7 = arith.constant 0 : index
    %8 = vector.load %arg6[%c0_6, %c0_7] : memref<1x4xf32, #tpu.memory_space<vmem>>, vector<1x1xf32>
    %9 = vector.broadcast %8 : vector<1x1xf32> to vector<8x96xf32>
    %10 = arith.subf %7, %9 : vector<8x96xf32>
    %c0_8 = arith.constant 0 : index
    %c1 = arith.constant 1 : index
    %11 = vector.load %arg6[%c0_8, %c1] : memref<1x4xf32, #tpu.memory_space<vmem>>, vector<1x1xf32>
    %12 = vector.broadcast %11 : vector<1x1xf32> to vector<8x96xf32>
    %13 = arith.mulf %10, %12 : vector<8x96xf32>
    %14 = tpu.iota {dimensions = array<i32: 1>} : vector<8x16xi32>
    %c0_9 = arith.constant 0 : index
    %c0_10 = arith.constant 0 : index
    %15 = vector.load %arg4[%c0_9, %c0_10] : memref<8x2xi32, #tpu.memory_space<vmem>>, vector<8x1xi32>
    %16 = vector.broadcast %15 : vector<8x1xi32> to vector<8x16xi32>
    %17 = arith.cmpi eq, %14, %16 : vector<8x16xi32>
    %18 = arith.extui %17 : vector<8x16xi1> to vector<8x16xi32>
    %19 = arith.sitofp %18 : vector<8x16xi32> to vector<8x16xf32>
    %c0_11 = arith.constant 0 : index
    %c0_12 = arith.constant 0 : index
    %c0_13 = arith.constant 0 : index
    %20 = vector.load %arg5[%c0_11, %c0_12, %c0_13] : memref<2x16x32xf32, #tpu.memory_space<vmem>>, vector<1x16x32xf32>
    %21 = vector.shape_cast %20 : vector<1x16x32xf32> to vector<16x32xf32>
    %cst_14 = arith.constant dense<0.000000e+00> : vector<8x32xf32>
    %22 = tpu.matmul %19, %21, %cst_14 {dimension_numbers = #tpu.dot_dimension_numbers<[1], [0], [0], [1], [0, 0, 1, 1], [], []>} : vector<8x16xf32>, vector<16x32xf32>, vector<8x32xf32> -> vector<8x32xf32>
    %23 = tpu.iota {dimensions = array<i32: 1>} : vector<8x16xi32>
    %c0_15 = arith.constant 0 : index
    %c1_16 = arith.constant 1 : index
    %24 = vector.load %arg4[%c0_15, %c1_16] : memref<8x2xi32, #tpu.memory_space<vmem>>, vector<8x1xi32>
    %25 = vector.broadcast %24 : vector<8x1xi32> to vector<8x16xi32>
    %26 = arith.cmpi eq, %23, %25 : vector<8x16xi32>
    %27 = arith.extui %26 : vector<8x16xi1> to vector<8x16xi32>
    %28 = arith.sitofp %27 : vector<8x16xi32> to vector<8x16xf32>
    %c1_17 = arith.constant 1 : index
    %c0_18 = arith.constant 0 : index
    %c0_19 = arith.constant 0 : index
    %29 = vector.load %arg5[%c1_17, %c0_18, %c0_19] : memref<2x16x32xf32, #tpu.memory_space<vmem>>, vector<1x16x32xf32>
    %30 = vector.shape_cast %29 : vector<1x16x32xf32> to vector<16x32xf32>
    %cst_20 = arith.constant dense<0.000000e+00> : vector<8x32xf32>
    %31 = tpu.matmul %28, %30, %cst_20 {dimension_numbers = #tpu.dot_dimension_numbers<[1], [0], [0], [1], [0, 0, 1, 1], [], []>} : vector<8x16xf32>, vector<16x32xf32>, vector<8x32xf32> -> vector<8x32xf32>
    %32 = tpu.concatenate %22, %31 in 1 : vector<8x32xf32>, vector<8x32xf32> -> vector<8x64xf32>
    %c0_21 = arith.constant 0 : index
    %c2 = arith.constant 2 : index
    %33 = vector.load %arg6[%c0_21, %c2] : memref<1x4xf32, #tpu.memory_space<vmem>>, vector<1x1xf32>
    %34 = vector.broadcast %33 : vector<1x1xf32> to vector<8x64xf32>
    %35 = arith.subf %32, %34 : vector<8x64xf32>
    %c0_22 = arith.constant 0 : index
    %c3 = arith.constant 3 : index
    %36 = vector.load %arg6[%c0_22, %c3] : memref<1x4xf32, #tpu.memory_space<vmem>>, vector<1x1xf32>
    %37 = vector.broadcast %36 : vector<1x1xf32> to vector<8x64xf32>
    %38 = arith.mulf %35, %37 : vector<8x64xf32>
    %39 = tpu.concatenate %13, %38 in 1 : vector<8x96xf32>, vector<8x64xf32> -> vector<8x160xf32>
    %c0_23 = arith.constant 0 : index
    %c0_24 = arith.constant 0 : index
    %40 = vector.load %arg7[%c0_23, %c0_24] : memref<160x320xf32, #tpu.memory_space<vmem>>, vector<160x320xf32>
    %cst_25 = arith.constant dense<0.000000e+00> : vector<8x320xf32>
    %41 = tpu.matmul %39, %40, %cst_25 {dimension_numbers = #tpu.dot_dimension_numbers<[1], [0], [0], [1], [0, 0, 1, 1], [], []>} : vector<8x160xf32>, vector<160x320xf32>, vector<8x320xf32> -> vector<8x320xf32>
    %c0_26 = arith.constant 0 : index
    %c0_27 = arith.constant 0 : index
    %42 = vector.load %arg8[%c0_26, %c0_27] : memref<1x320xf32, #tpu.memory_space<vmem>>, vector<1x320xf32>
    %43 = vector.broadcast %42 : vector<1x320xf32> to vector<8x320xf32>
    %44 = arith.addf %41, %43 : vector<8x320xf32>
    %cst_28 = arith.constant 0.000000e+00 : f32
    %45 = vector.broadcast %cst_28 : f32 to vector<8x320xf32>
    %46 = arith.maximumf %44, %45 : vector<8x320xf32>
    %c0_29 = arith.constant 0 : index
    %c0_30 = arith.constant 0 : index
    %47 = vector.load %arg11[%c0_29, %c0_30] : memref<320x10xf32, #tpu.memory_space<vmem>>, vector<320x10xf32>
    %cst_31 = arith.constant dense<0.000000e+00> : vector<8x10xf32>
    %48 = tpu.matmul %46, %47, %cst_31 {dimension_numbers = #tpu.dot_dimension_numbers<[1], [0], [0], [1], [0, 0, 1, 1], [], []>} : vector<8x320xf32>, vector<320x10xf32>, vector<8x10xf32> -> vector<8x10xf32>
    %49 = arith.mulf %46, %46 : vector<8x320xf32>
    %c0_32 = arith.constant 0 : index
    %c0_33 = arith.constant 0 : index
    %50 = vector.load %arg11[%c0_32, %c0_33] : memref<320x10xf32, #tpu.memory_space<vmem>>, vector<320x10xf32>
    %cst_34 = arith.constant dense<0.000000e+00> : vector<8x10xf32>
    %51 = tpu.matmul %49, %50, %cst_34 {dimension_numbers = #tpu.dot_dimension_numbers<[1], [0], [0], [1], [0, 0, 1, 1], [], []>} : vector<8x320xf32>, vector<320x10xf32>, vector<8x10xf32> -> vector<8x10xf32>
    %52 = arith.mulf %48, %48 : vector<8x10xf32>
    %53 = arith.subf %51, %52 : vector<8x10xf32>
    %cst_35 = arith.constant 0.000000e+00 : f32
    %54 = vector.broadcast %cst_35 : f32 to vector<8x10xf32>
    %55 = arith.maximumf %53, %54 : vector<8x10xf32>
    %cst_36 = arith.constant 9.99999974E-6 : f32
    %56 = vector.broadcast %cst_36 : f32 to vector<8x10xf32>
    %57 = arith.addf %55, %56 : vector<8x10xf32>
    %58 = math.rsqrt %57 : vector<8x10xf32>
    %c0_37 = arith.constant 0 : index
    %c0_38 = arith.constant 0 : index
    %59 = vector.load %arg12[%c0_37, %c0_38] : memref<10x320xf32, #tpu.memory_space<vmem>>, vector<10x320xf32>
    %cst_39 = arith.constant dense<0.000000e+00> : vector<8x320xf32>
    %60 = tpu.matmul %48, %59, %cst_39 {dimension_numbers = #tpu.dot_dimension_numbers<[1], [0], [0], [1], [0, 0, 1, 1], [], []>} : vector<8x10xf32>, vector<10x320xf32>, vector<8x320xf32> -> vector<8x320xf32>
    %c0_40 = arith.constant 0 : index
    %c0_41 = arith.constant 0 : index
    %61 = vector.load %arg12[%c0_40, %c0_41] : memref<10x320xf32, #tpu.memory_space<vmem>>, vector<10x320xf32>
    %cst_42 = arith.constant dense<0.000000e+00> : vector<8x320xf32>
    %62 = tpu.matmul %58, %61, %cst_42 {dimension_numbers = #tpu.dot_dimension_numbers<[1], [0], [0], [1], [0, 0, 1, 1], [], []>} : vector<8x10xf32>, vector<10x320xf32>, vector<8x320xf32> -> vector<8x320xf32>
    %63 = arith.subf %46, %60 : vector<8x320xf32>
    %64 = arith.mulf %63, %62 : vector<8x320xf32>
    %c0_43 = arith.constant 0 : index
    %c0_44 = arith.constant 0 : index
    %65 = vector.load %arg9[%c0_43, %c0_44] : memref<1x320xf32, #tpu.memory_space<vmem>>, vector<1x320xf32>
    %66 = vector.broadcast %65 : vector<1x320xf32> to vector<8x320xf32>
    %67 = arith.mulf %64, %66 : vector<8x320xf32>
    %c0_45 = arith.constant 0 : index
    %c0_46 = arith.constant 0 : index
    %68 = vector.load %arg10[%c0_45, %c0_46] : memref<1x320xf32, #tpu.memory_space<vmem>>, vector<1x320xf32>
    %69 = vector.broadcast %68 : vector<1x320xf32> to vector<8x320xf32>
    %70 = arith.addf %67, %69 : vector<8x320xf32>
    %c0_47 = arith.constant 0 : index
    %c0_48 = arith.constant 0 : index
    %71 = vector.load %arg13[%c0_47, %c0_48] : memref<320x10xf32, #tpu.memory_space<vmem>>, vector<320x10xf32>
    %cst_49 = arith.constant dense<0.000000e+00> : vector<8x10xf32>
    %72 = tpu.matmul %70, %71, %cst_49 {dimension_numbers = #tpu.dot_dimension_numbers<[1], [0], [0], [1], [0, 0, 1, 1], [], []>} : vector<8x320xf32>, vector<320x10xf32>, vector<8x10xf32> -> vector<8x10xf32>
    %c0_50 = arith.constant 0 : index
    %c0_51 = arith.constant 0 : index
    %73 = vector.load %arg14[%c0_50, %c0_51] : memref<1x10xf32, #tpu.memory_space<vmem>>, vector<1x10xf32>
    %74 = vector.broadcast %73 : vector<1x10xf32> to vector<8x10xf32>
    %75 = arith.addf %72, %74 : vector<8x10xf32>
    %c0_52 = arith.constant 0 : index
    %c0_53 = arith.constant 0 : index
    %76 = vector.load %arg15[%c0_52, %c0_53] : memref<8x10xf32, #tpu.memory_space<vmem>>, vector<8x10xf32>
    tpu.vector_store %arg15[%c0_52, %c0_53], %75 {strides = array<i32>} : memref<8x10xf32, #tpu.memory_space<vmem>>, vector<8x10xf32>,
    return
  }
  func.func @transform_0(%arg0: i32) -> (i32, i32) {
    %c0_i32 = arith.constant 0 : i32
    %c0_i32_0 = arith.constant 0 : i32
    return %arg0, %c0_i32 : i32, i32
  }
  func.func @transform_1(%arg0: i32) -> (i32, i32) {
    %c0_i32 = arith.constant 0 : i32
    %c0_i32_0 = arith.constant 0 : i32
    %c0_i32_1 = arith.constant 0 : i32
    return %c0_i32, %c0_i32_0 : i32, i32
  }
  func.func @transform_2(%arg0: i32) -> (i32, i32) {
    %c0_i32 = arith.constant 0 : i32
    %c0_i32_0 = arith.constant 0 : i32
    %c0_i32_1 = arith.constant 0 : i32
    return %c0_i32, %c0_i32_0 : i32, i32
  }
  func.func @transform_3(%arg0: i32) -> (i32, i32) {
    %c0_i32 = arith.constant 0 : i32
    %c0_i32_0 = arith.constant 0 : i32
    return %arg0, %c0_i32 : i32, i32
  }
  func.func @transform_4(%arg0: i32) -> (i32, i32, i32) {
    %c0_i32 = arith.constant 0 : i32
    %c0_i32_0 = arith.constant 0 : i32
    %c0_i32_1 = arith.constant 0 : i32
    %c0_i32_2 = arith.constant 0 : i32
    return %c0_i32, %c0_i32_0, %c0_i32_1 : i32, i32, i32
  }
  func.func @transform_5(%arg0: i32) -> (i32, i32) {
    %c0_i32 = arith.constant 0 : i32
    %c0_i32_0 = arith.constant 0 : i32
    %c0_i32_1 = arith.constant 0 : i32
    return %c0_i32, %c0_i32_0 : i32, i32
  }
  func.func @transform_6(%arg0: i32) -> (i32, i32) {
    %c0_i32 = arith.constant 0 : i32
    %c0_i32_0 = arith.constant 0 : i32
    %c0_i32_1 = arith.constant 0 : i32
    return %c0_i32, %c0_i32_0 : i32, i32
  }
  func.func @transform_7(%arg0: i32) -> (i32, i32) {
    %c0_i32 = arith.constant 0 : i32
    %c0_i32_0 = arith.constant 0 : i32
    %c0_i32_1 = arith.constant 0 : i32
    return %c0_i32, %c0_i32_0 : i32, i32
  }
  func.func @transform_8(%arg0: i32) -> (i32, i32) {
    %c0_i32 = arith.constant 0 : i32
    %c0_i32_0 = arith.constant 0 : i32
    %c0_i32_1 = arith.constant 0 : i32
    return %c0_i32, %c0_i32_0 : i32, i32
  }
  func.func @transform_9(%arg0: i32) -> (i32, i32) {
    %c0_i32 = arith.constant 0 : i32
    %c0_i32_0 = arith.constant 0 : i32
    %c0_i32_1 = arith.constant 0 : i32
    return %c0_i32, %c0_i32_0 : i32, i32
  }
  func.func @transform_10(%arg0: i32) -> (i32, i32) {
    %c0_i32 = arith.constant 0 : i32
    %c0_i32_0 = arith.constant 0 : i32
    %c0_i32_1 = arith.constant 0 : i32
    return %c0_i32, %c0_i32_0 : i32, i32
  }
  func.func @transform_11(%arg0: i32) -> (i32, i32) {
    %c0_i32 = arith.constant 0 : i32
    %c0_i32_0 = arith.constant 0 : i32
    %c0_i32_1 = arith.constant 0 : i32
    return %c0_i32, %c0_i32_0 : i32, i32
  }
  func.func @transform_12(%arg0: i32) -> (i32, i32) {
    %c0_i32 = arith.constant 0 : i32
    %c0_i32_0 = arith.constant 0 : i32
    %c0_i32_1 = arith.constant 0 : i32
    return %c0_i32, %c0_i32_0 : i32, i32
  }
  func.func @transform_13(%arg0: i32) -> (i32, i32) {
    %c0_i32 = arith.constant 0 : i32
    %c0_i32_0 = arith.constant 0 : i32
    %c0_i32_1 = arith.constant 0 : i32
    return %c0_i32, %c0_i32_0 : i32, i32
  }
  func.func @transform_14(%arg0: i32) -> (i32, i32) {
    %c0_i32 = arith.constant 0 : i32
    %c0_i32_0 = arith.constant 0 : i32
    return %arg0, %c0_i32 : i32, i32
  }
}

module attributes {stable_mosaic.version = 11 : i64} {
  func.func @_head_kernel(%arg0: i32, %arg1: memref<8x3xf32, #tpu.memory_space<vmem>>, %arg2: memref<3x96xf32, #tpu.memory_space<vmem>>, %arg3: memref<1x96xf32, #tpu.memory_space<vmem>>, %arg4: memref<8x2xi32, #tpu.memory_space<vmem>>, %arg5: memref<2x16x32xf32, #tpu.memory_space<vmem>>, %arg6: memref<8x10xf32, #tpu.memory_space<vmem>>, %arg7: memref<1x6xf32, #tpu.memory_space<vmem>>, %arg8: memref<10x2xf32, #tpu.memory_space<vmem>>, %arg9: memref<1x2xf32, #tpu.memory_space<vmem>>, %arg10: memref<1x2xf32, #tpu.memory_space<vmem>>, %arg11: memref<1x2xf32, #tpu.memory_space<vmem>>, %arg12: memref<5x160xf32, #tpu.memory_space<vmem>>, %arg13: memref<160x64xf32, #tpu.memory_space<vmem>>, %arg14: memref<1x32xf32, #tpu.memory_space<vmem>>, %arg15: memref<32x32xf32, #tpu.memory_space<vmem>>, %arg16: memref<1x32xf32, #tpu.memory_space<vmem>>, %arg17: memref<1x32xf32, #tpu.memory_space<vmem>>, %arg18: memref<1x32xf32, #tpu.memory_space<vmem>>, %arg19: memref<32x2xf32, #tpu.memory_space<vmem>>, %arg20: memref<1x2xf32, #tpu.memory_space<vmem>>, %arg21: memref<8x2xf32, #tpu.memory_space<vmem>>) attributes {dimension_semantics = [#tpu.dimension_semantics<parallel>], iteration_bounds = array<i64: 1>, scalar_prefetch = 0 : i64, scratch_operands = 0 : i64, tpu.core_type = #tpu.core_type<tc>, window_params = [{transform_indices = @transform_0, window_bounds = array<i64: 8, 3>}, {pipeline_mode = #tpu.pipeline_mode<synchronous>, transform_indices = @transform_1, window_bounds = array<i64: 3, 96>}, {pipeline_mode = #tpu.pipeline_mode<synchronous>, transform_indices = @transform_2, window_bounds = array<i64: 1, 96>}, {transform_indices = @transform_3, window_bounds = array<i64: 8, 2>}, {pipeline_mode = #tpu.pipeline_mode<synchronous>, transform_indices = @transform_4, window_bounds = array<i64: 2, 16, 32>}, {transform_indices = @transform_5, window_bounds = array<i64: 8, 10>}, {pipeline_mode = #tpu.pipeline_mode<synchronous>, transform_indices = @transform_6, window_bounds = array<i64: 1, 6>}, {pipeline_mode = #tpu.pipeline_mode<synchronous>, transform_indices = @transform_7, window_bounds = array<i64: 10, 2>}, {pipeline_mode = #tpu.pipeline_mode<synchronous>, transform_indices = @transform_8, window_bounds = array<i64: 1, 2>}, {pipeline_mode = #tpu.pipeline_mode<synchronous>, transform_indices = @transform_9, window_bounds = array<i64: 1, 2>}, {pipeline_mode = #tpu.pipeline_mode<synchronous>, transform_indices = @transform_10, window_bounds = array<i64: 1, 2>}, {pipeline_mode = #tpu.pipeline_mode<synchronous>, transform_indices = @transform_11, window_bounds = array<i64: 5, 160>}, {pipeline_mode = #tpu.pipeline_mode<synchronous>, transform_indices = @transform_12, window_bounds = array<i64: 160, 64>}, {pipeline_mode = #tpu.pipeline_mode<synchronous>, transform_indices = @transform_13, window_bounds = array<i64: 1, 32>}, {pipeline_mode = #tpu.pipeline_mode<synchronous>, transform_indices = @transform_14, window_bounds = array<i64: 32, 32>}, {pipeline_mode = #tpu.pipeline_mode<synchronous>, transform_indices = @transform_15, window_bounds = array<i64: 1, 32>}, {pipeline_mode = #tpu.pipeline_mode<synchronous>, transform_indices = @transform_16, window_bounds = array<i64: 1, 32>}, {pipeline_mode = #tpu.pipeline_mode<synchronous>, transform_indices = @transform_17, window_bounds = array<i64: 1, 32>}, {pipeline_mode = #tpu.pipeline_mode<synchronous>, transform_indices = @transform_18, window_bounds = array<i64: 32, 2>}, {pipeline_mode = #tpu.pipeline_mode<synchronous>, transform_indices = @transform_19, window_bounds = array<i64: 1, 2>}, {transform_indices = @transform_20, window_bounds = array<i64: 8, 2>}]} {
    %c0 = arith.constant 0 : index
    %c0_0 = arith.constant 0 : index
    %0 = vector.load %arg6[%c0, %c0_0] : memref<8x10xf32, #tpu.memory_space<vmem>>, vector<8x10xf32>
    %c0_1 = arith.constant 0 : index
    %c4 = arith.constant 4 : index
    %1 = vector.load %arg7[%c0_1, %c4] : memref<1x6xf32, #tpu.memory_space<vmem>>, vector<1x1xf32>
    %2 = vector.broadcast %1 : vector<1x1xf32> to vector<8x10xf32>
    %3 = arith.subf %0, %2 : vector<8x10xf32>
    %c0_2 = arith.constant 0 : index
    %c5 = arith.constant 5 : index
    %4 = vector.load %arg7[%c0_2, %c5] : memref<1x6xf32, #tpu.memory_space<vmem>>, vector<1x1xf32>
    %5 = vector.broadcast %4 : vector<1x1xf32> to vector<8x10xf32>
    %6 = arith.mulf %3, %5 : vector<8x10xf32>
    %c0_3 = arith.constant 0 : index
    %c0_4 = arith.constant 0 : index
    %7 = vector.load %arg8[%c0_3, %c0_4] : memref<10x2xf32, #tpu.memory_space<vmem>>, vector<10x2xf32>
    %cst = arith.constant dense<0.000000e+00> : vector<8x2xf32>
    %8 = tpu.matmul %6, %7, %cst {dimension_numbers = #tpu.dot_dimension_numbers<[1], [0], [0], [1], [0, 0, 1, 1], [], []>} : vector<8x10xf32>, vector<10x2xf32>, vector<8x2xf32> -> vector<8x2xf32>
    %c0_5 = arith.constant 0 : index
    %c0_6 = arith.constant 0 : index
    %9 = vector.load %arg9[%c0_5, %c0_6] : memref<1x2xf32, #tpu.memory_space<vmem>>, vector<1x2xf32>
    %10 = vector.broadcast %9 : vector<1x2xf32> to vector<8x2xf32>
    %11 = arith.addf %8, %10 : vector<8x2xf32>
    %cst_7 = arith.constant 0.000000e+00 : f32
    %12 = vector.broadcast %cst_7 : f32 to vector<8x2xf32>
    %13 = arith.maximumf %11, %12 : vector<8x2xf32>
    %c0_8 = arith.constant 0 : index
    %c0_9 = arith.constant 0 : index
    %14 = vector.load %arg10[%c0_8, %c0_9] : memref<1x2xf32, #tpu.memory_space<vmem>>, vector<1x2xf32>
    %c0_10 = arith.constant 0 : index
    %c0_11 = arith.constant 0 : index
    %15 = vector.load %arg11[%c0_10, %c0_11] : memref<1x2xf32, #tpu.memory_space<vmem>>, vector<1x2xf32>
    %cst_12 = arith.constant dense<0.000000e+00> : vector<8xf32>
    %16 = vector.multi_reduction <add>, %13, %cst_12 [1] : vector<8x2xf32> to vector<8xf32>
    %17 = vector.shape_cast %16 : vector<8xf32> to vector<8x1xf32>
    %cst_13 = arith.constant 2.000000e+00 : f32
    %18 = vector.broadcast %cst_13 : f32 to vector<8x1xf32>
    %19 = arith.divf %17, %18 : vector<8x1xf32>
    %20 = vector.broadcast %19 : vector<8x1xf32> to vector<8x2xf32>
    %21 = arith.subf %13, %20 : vector<8x2xf32>
    %22 = arith.mulf %21, %21 : vector<8x2xf32>
    %cst_14 = arith.constant dense<0.000000e+00> : vector<8xf32>
    %23 = vector.multi_reduction <add>, %22, %cst_14 [1] : vector<8x2xf32> to vector<8xf32>
    %24 = vector.shape_cast %23 : vector<8xf32> to vector<8x1xf32>
    %cst_15 = arith.constant 2.000000e+00 : f32
    %25 = vector.broadcast %cst_15 : f32 to vector<8x1xf32>
    %26 = arith.divf %24, %25 : vector<8x1xf32>
    %27 = vector.broadcast %19 : vector<8x1xf32> to vector<8x2xf32>
    %28 = arith.subf %13, %27 : vector<8x2xf32>
    %cst_16 = arith.constant 9.99999974E-6 : f32
    %29 = vector.broadcast %cst_16 : f32 to vector<8x1xf32>
    %30 = arith.addf %26, %29 : vector<8x1xf32>
    %31 = math.rsqrt %30 : vector<8x1xf32>
    %32 = vector.broadcast %31 : vector<8x1xf32> to vector<8x2xf32>
    %33 = arith.mulf %28, %32 : vector<8x2xf32>
    %34 = vector.broadcast %14 : vector<1x2xf32> to vector<8x2xf32>
    %35 = arith.mulf %33, %34 : vector<8x2xf32>
    %36 = vector.broadcast %15 : vector<1x2xf32> to vector<8x2xf32>
    %37 = arith.addf %35, %36 : vector<8x2xf32>
    %cst_17 = arith.constant dense<0xFF800000> : vector<8xf32>
    %38 = vector.multi_reduction <maximumf>, %37, %cst_17 [1] : vector<8x2xf32> to vector<8xf32>
    %39 = vector.shape_cast %38 : vector<8xf32> to vector<8x1xf32>
    %40 = vector.broadcast %39 : vector<8x1xf32> to vector<8x2xf32>
    %41 = arith.subf %37, %40 : vector<8x2xf32>
    %42 = math.exp %41 : vector<8x2xf32>
    %cst_18 = arith.constant dense<0.000000e+00> : vector<8xf32>
    %43 = vector.multi_reduction <add>, %42, %cst_18 [1] : vector<8x2xf32> to vector<8xf32>
    %44 = vector.shape_cast %43 : vector<8xf32> to vector<8x1xf32>
    %45 = vector.broadcast %44 : vector<8x1xf32> to vector<8x2xf32>
    %46 = arith.divf %42, %45 : vector<8x2xf32>
    %47 = vector.extract_strided_slice %6 {offsets = [0, 0], sizes = [8, 5], strides = [1, 1]} : vector<8x10xf32> to vector<8x5xf32>
    %48 = vector.extract_strided_slice %46 {offsets = [0, 0], sizes = [8, 1], strides = [1, 1]} : vector<8x2xf32> to vector<8x1xf32>
    %49 = vector.broadcast %48 : vector<8x1xf32> to vector<8x5xf32>
    %50 = arith.mulf %47, %49 : vector<8x5xf32>
    %51 = vector.extract_strided_slice %6 {offsets = [0, 5], sizes = [8, 5], strides = [1, 1]} : vector<8x10xf32> to vector<8x5xf32>
    %52 = vector.extract_strided_slice %46 {offsets = [0, 1], sizes = [8, 1], strides = [1, 1]} : vector<8x2xf32> to vector<8x1xf32>
    %53 = vector.broadcast %52 : vector<8x1xf32> to vector<8x5xf32>
    %54 = arith.mulf %51, %53 : vector<8x5xf32>
    %55 = arith.addf %50, %54 : vector<8x5xf32>
    %c0_19 = arith.constant 0 : index
    %c0_20 = arith.constant 0 : index
    %56 = vector.load %arg1[%c0_19, %c0_20] : memref<8x3xf32, #tpu.memory_space<vmem>>, vector<8x3xf32>
    %c0_21 = arith.constant 0 : index
    %c0_22 = arith.constant 0 : index
    %57 = vector.load %arg2[%c0_21, %c0_22] : memref<3x96xf32, #tpu.memory_space<vmem>>, vector<3x96xf32>
    %cst_23 = arith.constant dense<0.000000e+00> : vector<8x96xf32>
    %58 = tpu.matmul %56, %57, %cst_23 {dimension_numbers = #tpu.dot_dimension_numbers<[1], [0], [0], [1], [0, 0, 1, 1], [], []>} : vector<8x3xf32>, vector<3x96xf32>, vector<8x96xf32> -> vector<8x96xf32>
    %c0_24 = arith.constant 0 : index
    %c0_25 = arith.constant 0 : index
    %59 = vector.load %arg3[%c0_24, %c0_25] : memref<1x96xf32, #tpu.memory_space<vmem>>, vector<1x96xf32>
    %60 = vector.broadcast %59 : vector<1x96xf32> to vector<8x96xf32>
    %61 = arith.addf %58, %60 : vector<8x96xf32>
    %cst_26 = arith.constant 0.000000e+00 : f32
    %62 = vector.broadcast %cst_26 : f32 to vector<8x96xf32>
    %63 = arith.maximumf %61, %62 : vector<8x96xf32>
    %c0_27 = arith.constant 0 : index
    %c0_28 = arith.constant 0 : index
    %64 = vector.load %arg7[%c0_27, %c0_28] : memref<1x6xf32, #tpu.memory_space<vmem>>, vector<1x1xf32>
    %65 = vector.broadcast %64 : vector<1x1xf32> to vector<8x96xf32>
    %66 = arith.subf %63, %65 : vector<8x96xf32>
    %c0_29 = arith.constant 0 : index
    %c1 = arith.constant 1 : index
    %67 = vector.load %arg7[%c0_29, %c1] : memref<1x6xf32, #tpu.memory_space<vmem>>, vector<1x1xf32>
    %68 = vector.broadcast %67 : vector<1x1xf32> to vector<8x96xf32>
    %69 = arith.mulf %66, %68 : vector<8x96xf32>
    %70 = tpu.iota {dimensions = array<i32: 1>} : vector<8x16xi32>
    %c0_30 = arith.constant 0 : index
    %c0_31 = arith.constant 0 : index
    %71 = vector.load %arg4[%c0_30, %c0_31] : memref<8x2xi32, #tpu.memory_space<vmem>>, vector<8x1xi32>
    %72 = vector.broadcast %71 : vector<8x1xi32> to vector<8x16xi32>
    %73 = arith.cmpi eq, %70, %72 : vector<8x16xi32>
    %74 = arith.extui %73 : vector<8x16xi1> to vector<8x16xi32>
    %75 = arith.sitofp %74 : vector<8x16xi32> to vector<8x16xf32>
    %c0_32 = arith.constant 0 : index
    %c0_33 = arith.constant 0 : index
    %c0_34 = arith.constant 0 : index
    %76 = vector.load %arg5[%c0_32, %c0_33, %c0_34] : memref<2x16x32xf32, #tpu.memory_space<vmem>>, vector<1x16x32xf32>
    %77 = vector.shape_cast %76 : vector<1x16x32xf32> to vector<16x32xf32>
    %cst_35 = arith.constant dense<0.000000e+00> : vector<8x32xf32>
    %78 = tpu.matmul %75, %77, %cst_35 {dimension_numbers = #tpu.dot_dimension_numbers<[1], [0], [0], [1], [0, 0, 1, 1], [], []>} : vector<8x16xf32>, vector<16x32xf32>, vector<8x32xf32> -> vector<8x32xf32>
    %79 = tpu.iota {dimensions = array<i32: 1>} : vector<8x16xi32>
    %c0_36 = arith.constant 0 : index
    %c1_37 = arith.constant 1 : index
    %80 = vector.load %arg4[%c0_36, %c1_37] : memref<8x2xi32, #tpu.memory_space<vmem>>, vector<8x1xi32>
    %81 = vector.broadcast %80 : vector<8x1xi32> to vector<8x16xi32>
    %82 = arith.cmpi eq, %79, %81 : vector<8x16xi32>
    %83 = arith.extui %82 : vector<8x16xi1> to vector<8x16xi32>
    %84 = arith.sitofp %83 : vector<8x16xi32> to vector<8x16xf32>
    %c1_38 = arith.constant 1 : index
    %c0_39 = arith.constant 0 : index
    %c0_40 = arith.constant 0 : index
    %85 = vector.load %arg5[%c1_38, %c0_39, %c0_40] : memref<2x16x32xf32, #tpu.memory_space<vmem>>, vector<1x16x32xf32>
    %86 = vector.shape_cast %85 : vector<1x16x32xf32> to vector<16x32xf32>
    %cst_41 = arith.constant dense<0.000000e+00> : vector<8x32xf32>
    %87 = tpu.matmul %84, %86, %cst_41 {dimension_numbers = #tpu.dot_dimension_numbers<[1], [0], [0], [1], [0, 0, 1, 1], [], []>} : vector<8x16xf32>, vector<16x32xf32>, vector<8x32xf32> -> vector<8x32xf32>
    %88 = tpu.concatenate %78, %87 in 1 : vector<8x32xf32>, vector<8x32xf32> -> vector<8x64xf32>
    %c0_42 = arith.constant 0 : index
    %c2 = arith.constant 2 : index
    %89 = vector.load %arg7[%c0_42, %c2] : memref<1x6xf32, #tpu.memory_space<vmem>>, vector<1x1xf32>
    %90 = vector.broadcast %89 : vector<1x1xf32> to vector<8x64xf32>
    %91 = arith.subf %88, %90 : vector<8x64xf32>
    %c0_43 = arith.constant 0 : index
    %c3 = arith.constant 3 : index
    %92 = vector.load %arg7[%c0_43, %c3] : memref<1x6xf32, #tpu.memory_space<vmem>>, vector<1x1xf32>
    %93 = vector.broadcast %92 : vector<1x1xf32> to vector<8x64xf32>
    %94 = arith.mulf %91, %93 : vector<8x64xf32>
    %95 = tpu.concatenate %69, %94 in 1 : vector<8x96xf32>, vector<8x64xf32> -> vector<8x160xf32>
    %c0_44 = arith.constant 0 : index
    %c0_45 = arith.constant 0 : index
    %96 = vector.load %arg12[%c0_44, %c0_45] : memref<5x160xf32, #tpu.memory_space<vmem>>, vector<5x160xf32>
    %cst_46 = arith.constant dense<0.000000e+00> : vector<8x160xf32>
    %97 = tpu.matmul %55, %96, %cst_46 {dimension_numbers = #tpu.dot_dimension_numbers<[1], [0], [0], [1], [0, 0, 1, 1], [], []>} : vector<8x5xf32>, vector<5x160xf32>, vector<8x160xf32> -> vector<8x160xf32>
    %98 = arith.mulf %95, %97 : vector<8x160xf32>
    %c0_47 = arith.constant 0 : index
    %c0_48 = arith.constant 0 : index
    %99 = vector.load %arg13[%c0_47, %c0_48] : memref<160x64xf32, #tpu.memory_space<vmem>>, vector<160x64xf32>
    %cst_49 = arith.constant dense<0.000000e+00> : vector<8x64xf32>
    %100 = tpu.matmul %98, %99, %cst_49 {dimension_numbers = #tpu.dot_dimension_numbers<[1], [0], [0], [1], [0, 0, 1, 1], [], []>} : vector<8x160xf32>, vector<160x64xf32>, vector<8x64xf32> -> vector<8x64xf32>
    %101 = vector.extract_strided_slice %100 {offsets = [0, 0], sizes = [8, 32], strides = [1, 1]} : vector<8x64xf32> to vector<8x32xf32>
    %c0_50 = arith.constant 0 : index
    %c0_51 = arith.constant 0 : index
    %102 = vector.load %arg14[%c0_50, %c0_51] : memref<1x32xf32, #tpu.memory_space<vmem>>, vector<1x32xf32>
    %103 = vector.broadcast %102 : vector<1x32xf32> to vector<8x32xf32>
    %104 = arith.addf %101, %103 : vector<8x32xf32>
    %c0_52 = arith.constant 0 : index
    %c0_53 = arith.constant 0 : index
    %105 = vector.load %arg15[%c0_52, %c0_53] : memref<32x32xf32, #tpu.memory_space<vmem>>, vector<32x32xf32>
    %cst_54 = arith.constant dense<0.000000e+00> : vector<8x32xf32>
    %106 = tpu.matmul %104, %105, %cst_54 {dimension_numbers = #tpu.dot_dimension_numbers<[1], [0], [0], [1], [0, 0, 1, 1], [], []>} : vector<8x32xf32>, vector<32x32xf32>, vector<8x32xf32> -> vector<8x32xf32>
    %107 = vector.extract_strided_slice %100 {offsets = [0, 32], sizes = [8, 32], strides = [1, 1]} : vector<8x64xf32> to vector<8x32xf32>
    %108 = arith.addf %106, %107 : vector<8x32xf32>
    %c0_55 = arith.constant 0 : index
    %c0_56 = arith.constant 0 : index
    %109 = vector.load %arg16[%c0_55, %c0_56] : memref<1x32xf32, #tpu.memory_space<vmem>>, vector<1x32xf32>
    %110 = vector.broadcast %109 : vector<1x32xf32> to vector<8x32xf32>
    %111 = arith.addf %108, %110 : vector<8x32xf32>
    %cst_57 = arith.constant 0.000000e+00 : f32
    %112 = vector.broadcast %cst_57 : f32 to vector<8x32xf32>
    %113 = arith.maximumf %111, %112 : vector<8x32xf32>
    %c0_58 = arith.constant 0 : index
    %c0_59 = arith.constant 0 : index
    %114 = vector.load %arg17[%c0_58, %c0_59] : memref<1x32xf32, #tpu.memory_space<vmem>>, vector<1x32xf32>
    %c0_60 = arith.constant 0 : index
    %c0_61 = arith.constant 0 : index
    %115 = vector.load %arg18[%c0_60, %c0_61] : memref<1x32xf32, #tpu.memory_space<vmem>>, vector<1x32xf32>
    %cst_62 = arith.constant dense<0.000000e+00> : vector<8xf32>
    %116 = vector.multi_reduction <add>, %113, %cst_62 [1] : vector<8x32xf32> to vector<8xf32>
    %117 = vector.shape_cast %116 : vector<8xf32> to vector<8x1xf32>
    %cst_63 = arith.constant 3.200000e+01 : f32
    %118 = vector.broadcast %cst_63 : f32 to vector<8x1xf32>
    %119 = arith.divf %117, %118 : vector<8x1xf32>
    %120 = vector.broadcast %119 : vector<8x1xf32> to vector<8x32xf32>
    %121 = arith.subf %113, %120 : vector<8x32xf32>
    %122 = arith.mulf %121, %121 : vector<8x32xf32>
    %cst_64 = arith.constant dense<0.000000e+00> : vector<8xf32>
    %123 = vector.multi_reduction <add>, %122, %cst_64 [1] : vector<8x32xf32> to vector<8xf32>
    %124 = vector.shape_cast %123 : vector<8xf32> to vector<8x1xf32>
    %cst_65 = arith.constant 3.200000e+01 : f32
    %125 = vector.broadcast %cst_65 : f32 to vector<8x1xf32>
    %126 = arith.divf %124, %125 : vector<8x1xf32>
    %127 = vector.broadcast %119 : vector<8x1xf32> to vector<8x32xf32>
    %128 = arith.subf %113, %127 : vector<8x32xf32>
    %cst_66 = arith.constant 9.99999974E-6 : f32
    %129 = vector.broadcast %cst_66 : f32 to vector<8x1xf32>
    %130 = arith.addf %126, %129 : vector<8x1xf32>
    %131 = math.rsqrt %130 : vector<8x1xf32>
    %132 = vector.broadcast %131 : vector<8x1xf32> to vector<8x32xf32>
    %133 = arith.mulf %128, %132 : vector<8x32xf32>
    %134 = vector.broadcast %114 : vector<1x32xf32> to vector<8x32xf32>
    %135 = arith.mulf %133, %134 : vector<8x32xf32>
    %136 = vector.broadcast %115 : vector<1x32xf32> to vector<8x32xf32>
    %137 = arith.addf %135, %136 : vector<8x32xf32>
    %c0_67 = arith.constant 0 : index
    %c0_68 = arith.constant 0 : index
    %138 = vector.load %arg19[%c0_67, %c0_68] : memref<32x2xf32, #tpu.memory_space<vmem>>, vector<32x2xf32>
    %cst_69 = arith.constant dense<0.000000e+00> : vector<8x2xf32>
    %139 = tpu.matmul %137, %138, %cst_69 {dimension_numbers = #tpu.dot_dimension_numbers<[1], [0], [0], [1], [0, 0, 1, 1], [], []>} : vector<8x32xf32>, vector<32x2xf32>, vector<8x2xf32> -> vector<8x2xf32>
    %c0_70 = arith.constant 0 : index
    %c0_71 = arith.constant 0 : index
    %140 = vector.load %arg20[%c0_70, %c0_71] : memref<1x2xf32, #tpu.memory_space<vmem>>, vector<1x2xf32>
    %141 = vector.broadcast %140 : vector<1x2xf32> to vector<8x2xf32>
    %142 = arith.addf %139, %141 : vector<8x2xf32>
    %c0_72 = arith.constant 0 : index
    %c0_73 = arith.constant 0 : index
    %143 = vector.load %arg21[%c0_72, %c0_73] : memref<8x2xf32, #tpu.memory_space<vmem>>, vector<8x2xf32>
    tpu.vector_store %arg21[%c0_72, %c0_73], %142 {strides = array<i32>} : memref<8x2xf32, #tpu.memory_space<vmem>>, vector<8x2xf32>,
    return
  }
  func.func @transform_0(%arg0: i32) -> (i32, i32) {
    %c0_i32 = arith.constant 0 : i32
    %c0_i32_0 = arith.constant 0 : i32
    return %arg0, %c0_i32 : i32, i32
  }
  func.func @transform_1(%arg0: i32) -> (i32, i32) {
    %c0_i32 = arith.constant 0 : i32
    %c0_i32_0 = arith.constant 0 : i32
    %c0_i32_1 = arith.constant 0 : i32
    return %c0_i32, %c0_i32_0 : i32, i32
  }
  func.func @transform_2(%arg0: i32) -> (i32, i32) {
    %c0_i32 = arith.constant 0 : i32
    %c0_i32_0 = arith.constant 0 : i32
    %c0_i32_1 = arith.constant 0 : i32
    return %c0_i32, %c0_i32_0 : i32, i32
  }
  func.func @transform_3(%arg0: i32) -> (i32, i32) {
    %c0_i32 = arith.constant 0 : i32
    %c0_i32_0 = arith.constant 0 : i32
    return %arg0, %c0_i32 : i32, i32
  }
  func.func @transform_4(%arg0: i32) -> (i32, i32, i32) {
    %c0_i32 = arith.constant 0 : i32
    %c0_i32_0 = arith.constant 0 : i32
    %c0_i32_1 = arith.constant 0 : i32
    %c0_i32_2 = arith.constant 0 : i32
    return %c0_i32, %c0_i32_0, %c0_i32_1 : i32, i32, i32
  }
  func.func @transform_5(%arg0: i32) -> (i32, i32) {
    %c0_i32 = arith.constant 0 : i32
    %c0_i32_0 = arith.constant 0 : i32
    return %arg0, %c0_i32 : i32, i32
  }
  func.func @transform_6(%arg0: i32) -> (i32, i32) {
    %c0_i32 = arith.constant 0 : i32
    %c0_i32_0 = arith.constant 0 : i32
    %c0_i32_1 = arith.constant 0 : i32
    return %c0_i32, %c0_i32_0 : i32, i32
  }
  func.func @transform_7(%arg0: i32) -> (i32, i32) {
    %c0_i32 = arith.constant 0 : i32
    %c0_i32_0 = arith.constant 0 : i32
    %c0_i32_1 = arith.constant 0 : i32
    return %c0_i32, %c0_i32_0 : i32, i32
  }
  func.func @transform_8(%arg0: i32) -> (i32, i32) {
    %c0_i32 = arith.constant 0 : i32
    %c0_i32_0 = arith.constant 0 : i32
    %c0_i32_1 = arith.constant 0 : i32
    return %c0_i32, %c0_i32_0 : i32, i32
  }
  func.func @transform_9(%arg0: i32) -> (i32, i32) {
    %c0_i32 = arith.constant 0 : i32
    %c0_i32_0 = arith.constant 0 : i32
    %c0_i32_1 = arith.constant 0 : i32
    return %c0_i32, %c0_i32_0 : i32, i32
  }
  func.func @transform_10(%arg0: i32) -> (i32, i32) {
    %c0_i32 = arith.constant 0 : i32
    %c0_i32_0 = arith.constant 0 : i32
    %c0_i32_1 = arith.constant 0 : i32
    return %c0_i32, %c0_i32_0 : i32, i32
  }
  func.func @transform_11(%arg0: i32) -> (i32, i32) {
    %c0_i32 = arith.constant 0 : i32
    %c0_i32_0 = arith.constant 0 : i32
    %c0_i32_1 = arith.constant 0 : i32
    return %c0_i32, %c0_i32_0 : i32, i32
  }
  func.func @transform_12(%arg0: i32) -> (i32, i32) {
    %c0_i32 = arith.constant 0 : i32
    %c0_i32_0 = arith.constant 0 : i32
    %c0_i32_1 = arith.constant 0 : i32
    return %c0_i32, %c0_i32_0 : i32, i32
  }
  func.func @transform_13(%arg0: i32) -> (i32, i32) {
    %c0_i32 = arith.constant 0 : i32
    %c0_i32_0 = arith.constant 0 : i32
    %c0_i32_1 = arith.constant 0 : i32
    return %c0_i32, %c0_i32_0 : i32, i32
  }
  func.func @transform_14(%arg0: i32) -> (i32, i32) {
    %c0_i32 = arith.constant 0 : i32
    %c0_i32_0 = arith.constant 0 : i32
    %c0_i32_1 = arith.constant 0 : i32
    return %c0_i32, %c0_i32_0 : i32, i32
  }
  func.func @transform_15(%arg0: i32) -> (i32, i32) {
    %c0_i32 = arith.constant 0 : i32
    %c0_i32_0 = arith.constant 0 : i32
    %c0_i32_1 = arith.constant 0 : i32
    return %c0_i32, %c0_i32_0 : i32, i32
  }
  func.func @transform_16(%arg0: i32) -> (i32, i32) {
    %c0_i32 = arith.constant 0 : i32
    %c0_i32_0 = arith.constant 0 : i32
    %c0_i32_1 = arith.constant 0 : i32
    return %c0_i32, %c0_i32_0 : i32, i32
  }
  func.func @transform_17(%arg0: i32) -> (i32, i32) {
    %c0_i32 = arith.constant 0 : i32
    %c0_i32_0 = arith.constant 0 : i32
    %c0_i32_1 = arith.constant 0 : i32
    return %c0_i32, %c0_i32_0 : i32, i32
  }
  func.func @transform_18(%arg0: i32) -> (i32, i32) {
    %c0_i32 = arith.constant 0 : i32
    %c0_i32_0 = arith.constant 0 : i32
    %c0_i32_1 = arith.constant 0 : i32
    return %c0_i32, %c0_i32_0 : i32, i32
  }
  func.func @transform_19(%arg0: i32) -> (i32, i32) {
    %c0_i32 = arith.constant 0 : i32
    %c0_i32_0 = arith.constant 0 : i32
    %c0_i32_1 = arith.constant 0 : i32
    return %c0_i32, %c0_i32_0 : i32, i32
  }
  func.func @transform_20(%arg0: i32) -> (i32, i32) {
    %c0_i32 = arith.constant 0 : i32
    %c0_i32_0 = arith.constant 0 : i32
    return %arg0, %c0_i32 : i32, i32
  }
}

</mosaic_0001>

<bundles_post_ra>
// kernel: _forward_impl.3
= control target key start
LH: loop header
LB: loop body
LE: loop exit
PB: predicated region body
PF: predicated region fallthrough
CT: control target
= control target key end

     0   :  { %v1089_v0 = vmov 4   ;;  %vm95_vm0 = vcmask 1041408   ;;  %v1090_v2 = vmov 0.0|0.0   ;;  %vm1091_vm1 = vmmov 1   ;;  %s1100_s24 = smov 32   ;;  %s1427_s6 = inlined_call_operand.vmem [shape: f32[1,6], index: 6, kind: input, shape index: {}]   ;;  %s1428_s7 = inlined_call_operand.vmem [shape: f32[10,2], index: 7, kind: input, shape index: {}]   ;;  %s1429_s5 = inlined_call_operand.vmem [shape: f32[8,10], index: 5, kind: input, shape index: {}]   ;;  %s1430_s8 = inlined_call_operand.vmem [shape: f32[1,2], index: 8, kind: input, shape index: {}]   ;;  %s1431_s9 = inlined_call_operand.vmem [shape: f32[1,2], index: 9, kind: input, shape index: {}]   ;;  %s1432_s10 = inlined_call_operand.vmem [shape: f32[1,2], index: 10, kind: input, shape index: {}]   ;;  %s1433_s3 = inlined_call_operand.vmem [shape: s32[8,2], index: 3, kind: input, shape index: {}]   ;;  %s1434_s1 = inlined_call_operand.vmem [shape: f32[3,96], index: 1, kind: input, shape index: {}]   ;;  %s1435_s0 = inlined_call_operand.vmem [shape: f32[8,3], index: 0, kind: input, shape index: {}]   ;;  %s1436_s4 = inlined_call_operand.vmem [shape: f32[2,16,32], index: 4, kind: input, shape index: {}]   ;;  %s1437_s11 = inlined_call_operand.vmem [shape: f32[5,160], index: 11, kind: input, shape index: {}]   ;;  %s1438_s12 = inlined_call_operand.vmem [shape: f32[160,64], index: 12, kind: input, shape index: {}]   ;;  %s1439_s14 = inlined_call_operand.vmem [shape: f32[32,32], index: 14, kind: input, shape index: {}]   ;;  %s1440_s2 = inlined_call_operand.vmem [shape: f32[1,96], index: 2, kind: input, shape index: {}]   ;;  %s1441_s13 = inlined_call_operand.vmem [shape: f32[1,32], index: 13, kind: input, shape index: {}]   ;;  %s1442_s15 = inlined_call_operand.vmem [shape: f32[1,32], index: 15, kind: input, shape index: {}]   ;;  %s1443_s18 = inlined_call_operand.vmem [shape: f32[32,2], index: 18, kind: input, shape index: {}]   ;;  %s1444_s16 = inlined_call_operand.vmem [shape: f32[1,32], index: 16, kind: input, shape index: {}]   ;;  %s1445_s17 = inlined_call_operand.vmem [shape: f32[1,32], index: 17, kind: input, shape index: {}]   ;;  %s1446_s19 = inlined_call_operand.vmem [shape: f32[1,2], index: 19, kind: input, shape index: {}]   ;;  %s1447_s20 = inlined_call_operand.vmem [shape: f32[8,2], index: 20, kind: output, shape index: {}]  }
   0x1   :  { %1449 = sst [smem:[#allocation2_spill]] %s1427_s6  ;;  %1071 = vset.pattern.permute.xlu0 %v1089_v0  ;;  %1006 = vmatprep.subr.bf16.mxu1 %v1090_v2  ;;  %vm1008_vm2 = vmpackc.low %vm95_vm0, %vm1091_vm1  ;;  %v1092_v6 = vmov 5   ;;  %vm1093_vm3 = vmmov 0   ;;  %v1094_v7 = vmov 0.0   ;;  %vm91_vm4 = vcmask 80896   ;;  %v328_v35 = vld [vmem:[%s1433_s3] sm:$0xff] }
   0x2   :  { %1450 = sst [smem:[#allocation3_spill]] %s1428_s7  ;;  %s1454_s23 = sld [smem:[#allocation2_spill]]  ;;  %1016 = vmatprep.subr.bf16.mxu0 %v1090_v2  ;;  %962 = vmatprep.mubr.msk.f32.mxu1 %vm1093_vm3, %v1094_v7  ;;  %vm172_vm5 = vcmask 15360   ;;  %v1095_v24 = vmov 0   ;;  %v916_v31 = vld [vmem:[%s1432_s10] ss:$0 sm:$0xff]  ;;  %v326_v42 = vlaneseq }
   0x3   :  { %1451 = sst [smem:[#allocation4_spill]] %s1429_s5  ;;  %s1455_s25 = sld [smem:[#allocation3_spill]]  ;;  %1073 = vset.pattern.permute.xlu1 %v1095_v24  ;;  %v1096_v36 = vmov 1   ;;  %vm241_vm6 = vcmask 1042432   ;;  %vm237_vm7 = vcmask 23552   ;;  %v228_v38 = vld [vmem:[%s1435_s0] sm:$0xff] }
   0x4   :  { %1452 = sst [smem:[#allocation5_spill]] %s1430_s8  ;;  %v229_v37 = vld [vmem:[%s1434_s1] sm:$0x7]  ;;  %v336_v40 = vld [vmem:[%s1436_s4 + $0x8] sm:$0xff]  ;;  %v327_v45 = vand.u32 127, %v326_v42  ;;  %v923_v46 = vld [vmem:[%s1436_s4 + $0x10] sm:$0xff] }
   0x5   :  { %1453 = sst [smem:[#allocation6_spill]] %s1431_s9  ;;  %s1456_s9 = sld [smem:[#allocation4_spill]]  ;;  %v335_v39 = vld [vmem:[%s1436_s4] sm:$0xff]  ;;  %v924_v47 = vld [vmem:[%s1436_s4 + $0x18] sm:$0xff]  ;;  %vm337_vm8 = vcmask 130048   ;;  %v1097_v61 = vmov 2  }
   0x6   :  { %s1457_s6 = sld [smem:[#allocation5_spill]]  ;;  %s1458_s22 = sld [smem:[#allocation6_spill]]  ;;  %v1011_v41 = vpack.c.bf16 %v336_v40, %v335_v39  ;;  %v1014_v50 = vpack.c.bf16 %v924_v47, %v923_v46  ;;  %v1098_v62 = vmov 3   ;;  %vm521_vm11 = vcmask 1044480   ;;  %v515_v63 = vld [vmem:[%s1437_s11] sm:$0x1f] }
   0x7   :  { %v516_v0 = vld [vmem:[%s1437_s11 + $0x8] sm:$0x1f]  ;;  %vm517_vm12 = vcmask 39936   ;;  %vm497_vm13 = vcmask 261120   ;;  %v615_v40 = vld [vmem:[%s1438_s12 + $0x70] sm:$0xff]  ;;  %v620_v47 = vld [vmem:[%s1438_s12 + $0x98] sm:$0xff] }
   0x8   :  { %v1210_v1 = vld [vmem:[%s1454_s23] ss:$0 sm:$0xff]  ;;  %s1099_s23 = smov 123   ;;  %v619_v46 = vld [vmem:[%s1438_s12 + $0x90] sm:$0xff]  ;;  %vm513_vm14 = vcmask 785408  }
   0x9   :  { %73 = vperm.xlu0 %1071, %v1210_v1   ;;  %v82_v3 = vld [vmem:[%s1455_s25] sm:$0xff]  ;;  %v83_v4 = vld [vmem:[%s1455_s25 + $0x8] sm:$0x3] }
   0xa   :  { %v1007_v5 = vpack.c.bf16 %v83_v4, %v82_v3 }
   0xb   :  { %v65_v9 = vld [vmem:[%s1456_s9] sm:$0xff] }
   0xc   :  { %1009 = vmatpush3.bf16.msk.msra.mxu1 %vm1008_vm2, %v1007_v5  ;;  %v912_v13 = vld [vmem:[%s1457_s6] ss:$0 sm:$0xff] }
   0xd   :  { %1072 = vset.pattern.permute.xlu0 %v1092_v6  ;;  %965 = vmatprep.subr.mxu1 %v1094_v7  ;;  %v915_v29 = vld [vmem:[%s1458_s22] ss:$0 sm:$0xff] }
   0xe   :  { %78 = vperm.xlu0 %1072, %v1210_v1  }
  0x12   :  { %1076 = vset.pattern.permute.xlu0 %v1097_v61 }
  0x88   :  { %v74_v8 = vpop.permute.xlu0 %73 }
  0x89   :  { %v76_v10 = vsub.f32 %v65_v9, %v74_v8 }
  0x8d   :  { %v79_v11 = vpop.permute.xlu0 %78 }
  0x8e   :  { %v1228_v12 = vmul.f32 %v79_v11, %v76_v10 }
  0x90   :  { %963 = vmatmul.mubr.msk.f32.vlgmr.msra.gmra.mrb[0].mxu1 %vm91_vm4, %v1228_v12 }
  0x91   :  { %967 = vmatprep.mubr.msk.f32.mxu1 %vm1093_vm3, %v1094_v7  ;;  %966 = vmatpush3.msk.msra.mxu1 %vm241_vm6, %v229_v37  ;;  %v613_v37 = vld [vmem:[%s1438_s12 + $0x60] sm:$0xff] }
  0x92   :  { %1010 = vmatprep.subr.bf16.mxu1 %v1090_v2 }
  0x94   :  { %968 = vmatmul.mubr.msk.f32.vlgmr.msra.gmra.mrb[2].mxu1 %vm237_vm7, %v228_v38  ;;  %v614_v38 = vld [vmem:[%s1438_s12 + $0x68] sm:$0xff] }
  0x95   :  { %974 = vmatprep.mubr.msk.f32.mxu1 %vm1093_vm3, %v1094_v7  ;;  %1012 = vmatpush3.bf16.msra.mxu1 %v1011_v41  ;;  %v1035_v39 = vpack.c.bf16 %v614_v38, %v613_v37  ;;  %v616_v41 = vld [vmem:[%s1438_s12 + $0x78] sm:$0xff] }
  0x96   :  { %1013 = vmatprep.subr.bf16.mxu1 %v1090_v2  ;;  %v1038_v42 = vpack.c.bf16 %v616_v41, %v615_v40 }
 0x163   :  { %v165_v14 = vpop.f32.mrb[0].mxu1 }
 0x164   :  { %v166_v15 = vadd.f32 %v912_v13, %v165_v14  ;;  %v964_v16 = vpop.f32.mrb[1].mxu1 }
 0x165   :  { %v602_v16 = vld [vmem:[%s1438_s12 + $0x8] sm:$0xff] }
 0x166   :  { %v169_v17 = vmax.f32 %v166_v15, 0.0  ;;  %v601_v15 = vld [vmem:[%s1438_s12] sm:$0xff] }
 0x167   :  { %v1279_v59 = vpop.f32.mrb[2].mxu1 }
 0x168   :  { %v173_v18 = vsel %vm172_vm5, %v169_v17, 0.0  ;;  %v969_v60 = vpop.f32.mrb[3].mxu1 }
 0x169   :  { %174 = vadd.xlane.f32.xlu1 %v173_v18 }
 0x1f6   :  { %v175_v19 = vpop.xlane.xlu1 %174 }
 0x1f7   :  { %v177_v20 = vmul.f32 0.5, %v175_v19 }
 0x1f9   :  { %v178_v21 = vsub.f32 %v169_v17, %v177_v20  ;;  %v604_v17 = vld [vmem:[%s1438_s12 + $0x18] sm:$0xff]  ;;  %v605_v20 = vld [vmem:[%s1438_s12 + $0x20] sm:$0xff] }
 0x1fb   :  { %v179_v22 = vmul.f32 %v178_v21, %v178_v21 }
 0x1fd   :  { %v180_v23 = vsel %vm172_vm5, %v179_v22, 0.0 }
 0x1fe   :  { %181 = vadd.xlane.f32.xlu1 %v180_v23 }
 0x28b   :  { %v182_v25 = vpop.xlane.xlu1 %181 }
 0x28c   :  { %v183_v26 = vmul.f32 0.5, %v182_v25 }
 0x28e   :  { %v184_v27 = vadd.f32 1e-05, %v183_v26  ;;  %v607_v26 = vld [vmem:[%s1438_s12 + $0x30] sm:$0xff] }
 0x290   :  { %1081 = vrsqrt.f32 %v184_v27  ;;  %v608_v27 = vld [vmem:[%s1438_s12 + $0x38] sm:$0xff] }
 0x29a   :  { %v1082_v28 = vpop.eup %1081 }
 0x29b   :  { %v186_v30 = vmul.f32 %v1082_v28, %v178_v21  ;;  %v606_v21 = vld [vmem:[%s1438_s12 + $0x28] sm:$0xff] }
 0x29d   :  { %v193_v32 = vmul.f32 %v915_v29, %v186_v30  ;;  %v1026_v30 = vpack.c.bf16 %v608_v27, %v607_v26  ;;  %v825_v26 = vld [vmem:[%s1443_s18 + $0x18] sm:$0xff] }
 0x29f   :  { %v200_v33 = vadd.f32 %v916_v31, %v193_v32  ;;  %v609_v31 = vld [vmem:[%s1438_s12 + $0x40] sm:$0xff]  ;;  %v610_v32 = vld [vmem:[%s1438_s12 + $0x48] sm:$0xff] }
 0x2a1   :  { %v201_v34 = vsel %vm172_vm5, %v200_v33, -inf }
 0x2a2   :  { %202 = vmax.xlane.f32.xlu1 %v201_v34  ;;  %v611_v34 = vld [vmem:[%s1438_s12 + $0x50] sm:$0xff] }
 0x2b3   :  { %330 = vperm.xlu1 %1073, %v328_v35  }
 0x2b7   :  { %1074 = vset.pattern.permute.xlu1 %v1096_v36 }
 0x2b8   :  { %412 = vperm.xlu1 %1074, %v328_v35   ;;  %v612_v35 = vld [vmem:[%s1438_s12 + $0x58] sm:$0xff] }
 0x32f   :  { %v203_v43 = vpop.xlane.xlu1 %202 }
 0x330   :  { %v204_v44 = vsub.f32 %v200_v33, %v203_v43  ;;  %v1029_v33 = vpack.c.bf16 %v610_v32, %v609_v31  ;;  %v617_v43 = vld [vmem:[%s1438_s12 + $0x80] sm:$0xff] }
 0x331   :  { %v933_v32 = vld [vmem:[%s1444_s16] ss:$0 sm:$0xff] }
 0x332   :  { %v205_v48 = vmul.f32 1.442695, %v204_v44  ;;  %v618_v44 = vld [vmem:[%s1438_s12 + $0x88] sm:$0xff] }
 0x333   :  { %v331_v49 = vpop.permute.xlu1 %330 }
 0x334   :  { %1083 = vpow2.f32 %v205_v48  ;;  %vm332_vm9 = vcmp.eq.s32.totalorder %v327_v45, %v331_v49  ;;  %v1044_v48 = vpack.c.bf16 %v620_v47, %v619_v46  ;;  %v702_v49 = vld [vmem:[%s1439_s14] sm:$0xff] }
 0x335   :  { %v920_v51 = vsel %vm332_vm9, 1.0, %v1094_v7 }
 0x336   :  { %975 = vmatmul.mubr.msk.f32.vlgmr.msra.gmra.mrb[4].mxu1 %vm337_vm8, %v920_v51 }
 0x337   :  { %v413_v52 = vpop.permute.xlu1 %412  ;;  %1015 = vmatpush3.bf16.msra.mxu1 %v1014_v50  ;;  %981 = vmatprep.mubr.msk.f32.mxu1 %vm1093_vm3, %v1094_v7  ;;  %v703_v50 = vld [vmem:[%s1439_s14 + $0x8] sm:$0xff] }
 0x338   :  { %vm414_vm10 = vcmp.eq.s32.totalorder %v327_v45, %v413_v52  ;;  %926 = vmatprep.subr.msk.mxu1 %vm521_vm11, %v516_v0  ;;  %v1041_v45 = vpack.c.bf16 %v618_v44, %v617_v43  ;;  %v1047_v51 = vpack.c.bf16 %v703_v50, %v702_v49  ;;  %v917_v52 = vld [vmem:[%s1440_s2] ss:$0 sm:$0xff] }
 0x339   :  { %v922_v53 = vsel %vm414_vm10, 1.0, %v1094_v7 }
 0x33a   :  { %982 = vmatmul.mubr.msk.f32.vlgmr.msra.gmra.mrb[6].mxu1 %vm337_vm8, %v922_v53 }
 0x33b   :  { %592 = vmatprep.mubr.f32.mxu1 %v1094_v7  ;;  %927 = vmatpush1.msk.msra.mxu1 %vm521_vm11, %v515_v63 }
 0x33c   :  { %1046 = vmatprep.subr.bf16.mxu1 %v1090_v2 }
 0x33e   :  { %v1084_v54 = vpop.eup %1083 }
 0x33f   :  { %v207_v55 = vsel %vm172_vm5, %v1084_v54, 0.0 }
 0x340   :  { %208 = vadd.xlane.f32.xlu0 %v207_v55 }
 0x356   :  { %500 = vperm.xlu0 %1076, %v1210_v1  }
 0x35a   :  { %1080 = vset.pattern.permute.xlu0 %v1098_v62 }
 0x3cd   :  { %v209_v56 = vpop.xlane.xlu0 %208 }
 0x3ce   :  { %1085 = vrcp.f32 %v209_v56 }
 0x3d5   :  { %v501_v22 = vpop.permute.xlu0 %500 }
 0x3d8   :  { %v1086_v57 = vpop.eup %1085 }
 0x3d9   :  { %v211_v58 = vmul.f32 %v1086_v57, %v1084_v54  ;;  %v312_v54 = vadd.f32 %v917_v52, %v1279_v59  ;;  %v705_v59 = vld [vmem:[%s1439_s14 + $0x18] sm:$0xff] }
 0x3db   :  { %219 = vperm.xlu1 %1074, %v211_v58   ;;  %v315_v56 = vmax.f32 %v312_v54, 0.0 }
 0x3df   :  { %1075 = vset.pattern.permute.xlu1 %v1095_v24 }
 0x3e0   :  { %214 = vperm.xlu1 %1075, %v211_v58  }
 0x3e4   :  { %1077 = vset.pattern.permute.xlu1 %v1098_v62 }
 0x409   :  { %v407_v3 = vpop.f32.mrb[4].mxu1 }
 0x40a   :  { %v976_v4 = vpop.f32.mrb[5].mxu1 }
 0x40b   :  { %v704_v4 = vld [vmem:[%s1439_s14 + $0x10] sm:$0xff] }
 0x40d   :  { %v489_v5 = vpop.f32.mrb[6].mxu1 }
 0x40e   :  { %v983_v6 = vpop.f32.mrb[7].mxu1 }
 0x40f   :  { %v930_v6 = vld [vmem:[%s1441_s13] ss:$0 sm:$0xff] }
 0x45a   :  { %v220_v8 = vpop.permute.xlu1 %219 }
 0x45b   :  { %v222_v9 = vmul.f32 %v220_v8, %v1228_v12 }
 0x45d   :  { %224 = vrot.lane.b32.xlu1 %v222_v9, %s1099_s23 }
 0x45f   :  { %v215_v10 = vpop.permute.xlu1 %214 }
 0x460   :  { %v217_v11 = vmul.f32 %v215_v10, %v1228_v12  ;;  %v1017_v12 = vpack.c.bf16 %v602_v16, %v601_v15 }
 0x461   :  { %505 = vperm.xlu1 %1077, %v1210_v1  }
 0x462   :  { %1018 = vmatpush1.bf16.msra.mxu0 %v1017_v12 }
 0x463   :  { %1019 = vmatprep.subr.bf16.mxu0 %v1090_v2 }
 0x465   :  { %494 = vrot.lane.b32.xlu1 %v489_v5, %s1100_s24  ;;  %s1101_s24 = smov 96   ;;  %v1050_v5 = vpack.c.bf16 %v705_v59, %v704_v4 }
 0x466   :  { %1078 = vset.pattern.permute.xlu1 %v1095_v24  ;;  %v1023_v24 = vpack.c.bf16 %v606_v21, %v605_v20 }
 0x469   :  { %317 = vperm.xlu1 %1078, %v1210_v1  }
 0x46d   :  { %1079 = vset.pattern.permute.xlu1 %v1096_v36  ;;  %v1032_v36 = vpack.c.bf16 %v612_v35, %v611_v34 }
 0x46e   :  { %322 = vperm.xlu1 %1079, %v1210_v1   ;;  %v603_v1 = vld [vmem:[%s1438_s12 + $0x10] sm:$0xff] }
 0x46f   :  { %v1020_v19 = vpack.c.bf16 %v604_v17, %v603_v1 }
 0x471   :  { %1021 = vmatpush1.bf16.msra.mxu0 %v1020_v19 }
 0x472   :  { %1022 = vmatprep.subr.bf16.mxu0 %v1090_v2 }
 0x475   :  { %1024 = vmatpush1.bf16.msra.mxu0 %v1023_v24 }
 0x476   :  { %1025 = vmatprep.subr.bf16.mxu0 %v1090_v2 }
 0x479   :  { %1027 = vmatpush1.bf16.msra.mxu0 %v1026_v30 }
 0x47a   :  { %1028 = vmatprep.subr.bf16.mxu0 %v1090_v2 }
 0x47d   :  { %1030 = vmatpush1.bf16.msra.mxu0 %v1029_v33  ;;  %v934_v33 = vld [vmem:[%s1445_s17] ss:$0 sm:$0xff] }
 0x47e   :  { %1031 = vmatprep.subr.bf16.mxu0 %v1090_v2 }
 0x481   :  { %1033 = vmatpush1.bf16.msra.mxu0 %v1032_v36  ;;  %v935_v36 = vld [vmem:[%s1446_s19] ss:$0 sm:$0xff] }
 0x482   :  { %1034 = vmatprep.subr.bf16.mxu0 %v1090_v2 }
 0x485   :  { %1036 = vmatpush1.bf16.msra.mxu0 %v1035_v39 }
 0x486   :  { %1037 = vmatprep.subr.bf16.mxu0 %v1090_v2 }
 0x489   :  { %1039 = vmatpush1.bf16.msra.mxu0 %v1038_v42 }
 0x48a   :  { %1040 = vmatprep.subr.bf16.mxu0 %v1090_v2 }
 0x48d   :  { %1042 = vmatpush1.bf16.msra.mxu0 %v1041_v45 }
 0x48e   :  { %1043 = vmatprep.subr.bf16.mxu0 %v1090_v2 }
 0x491   :  { %1045 = vmatpush1.bf16.msra.mxu0 %v1044_v48 }
 0x4cf   :  { %v225_v13 = vpop.permute.xlu1 %224 }
 0x4d0   :  { %v227_v14 = vadd.f32 %v225_v13, %v217_v11 }
 0x4d2   :  { %928 = vmatmul.mubr.msk.f32.vlgmr.msra.gmra.mrb[8].mxu1 %vm517_vm12, %v227_v14  ;;  %v932_v14 = vld [vmem:[%s1442_s15] ss:$0 sm:$0xff] }
 0x4d3   :  { %992 = vmatprep.mubr.msk.f32.mxu1 %vm1093_vm3, %v1094_v7  ;;  %1048 = vmatpush3.bf16.msra.mxu1 %v1047_v51 }
 0x4d4   :  { %1049 = vmatprep.subr.bf16.mxu1 %v1090_v2 }
 0x4d7   :  { %1051 = vmatpush3.bf16.msra.mxu1 %v1050_v5 }
 0x4d8   :  { %1052 = vmatprep.subr.bf16.mxu1 %v1090_v2 }
 0x4e0   :  { %v506_v18 = vpop.permute.xlu1 %505 }
 0x4e4   :  { %v495_v23 = vpop.permute.xlu1 %494 }
 0x4e5   :  { %v498_v25 = vsel %vm497_vm13, %v407_v3, %v495_v23  ;;  %v823_v23 = vld [vmem:[%s1443_s18 + $0x8] sm:$0xff] }
 0x4e6   :  { %v503_v28 = vsub.f32 %v498_v25, %v501_v22  ;;  %v824_v25 = vld [vmem:[%s1443_s18 + $0x10] sm:$0xff] }
 0x4e7   :  { %v1056_v27 = vpack.c.bf16 %v825_v26, %v824_v25 }
 0x4e8   :  { %v508_v29 = vmul.f32 %v506_v18, %v503_v28  ;;  %v318_v53 = vpop.permute.xlu1 %317 }
 0x4e9   :  { %v320_v57 = vsub.f32 %v315_v56, %v318_v53 }
 0x4ea   :  { %510 = vrot.lane.b32.xlu1 %v508_v29, %s1101_s24 }
 0x4ed   :  { %v323_v55 = vpop.permute.xlu1 %322 }
 0x4ee   :  { %v325_v60 = vmul.f32 %v323_v55, %v320_v57 }
 0x55c   :  { %v511_v58 = vpop.permute.xlu1 %510 }
 0x55d   :  { %v514_v61 = vsel %vm513_vm14, %v325_v60, %v511_v58 }
 0x5a5   :  { %v594_v62 = vpop.f32.mrb[8].mxu1 }
 0x5a6   :  { %v599_v63 = vmul.f32 %v594_v62, %v514_v61  ;;  %v596_v0 = vpop.f32.mrb[9].mxu1 }
 0x5a7   :  { %v600_v3 = vmul.f32 %v596_v0, %v511_v58 }
 0x5a9   :  { %929 = vmatprep.mubr.msk.f32.mxu0 %vm497_vm13, %v600_v3 }
 0x5aa   :  { %689 = vmatmul.mubr.f32.vlgmr.msra.gmra.mrb[0].mxu0 %v599_v63 }
 0x67d   :  { %v690_v8 = vpop.f32.mrb[0].mxu0 }
 0x67e   :  { %v701_v9 = vadd.f32 %v930_v6, %v690_v8  ;;  %707 = vrot.lane.b32.xlu1 %v690_v8, %s1101_s24  ;;  %v692_v10 = vpop.f32.mrb[1].mxu0 }
 0x680   :  { %993 = vmatmul.mubr.msk.f32.vlgmr.msra.gmra.mrb[10].mxu1 %vm497_vm13, %v701_v9 }
 0x681   :  { %1003 = vmatprep.mubr.msk.f32.mxu1 %vm1093_vm3, %v1094_v7  ;;  %v822_v7 = vld [vmem:[%s1443_s18] sm:$0xff] }
 0x682   :  { %v1053_v24 = vpack.c.bf16 %v823_v23, %v822_v7 }
 0x684   :  { %1054 = vmatpush3.bf16.msra.mxu1 %v1053_v24 }
 0x685   :  { %1055 = vmatprep.subr.bf16.mxu1 %v1090_v2 }
 0x688   :  { %1057 = vmatpush3.bf16.msra.mxu1 %v1056_v27 }
 0x6f0   :  { %v708_v11 = vpop.permute.xlu1 %707 }
 0x753   :  { %v779_v13 = vpop.f32.mrb[10].mxu1 }
 0x754   :  { %v780_v15 = vadd.f32 %v779_v13, %v708_v11  ;;  %v994_v16 = vpop.f32.mrb[11].mxu1 }
 0x756   :  { %v790_v1 = vadd.f32 %v932_v14, %v780_v15 }
 0x758   :  { %v791_v12 = vmax.f32 %v790_v1, 0.0 }
 0x75a   :  { %v794_v17 = vsel %vm497_vm13, %v791_v12, 0.0 }
 0x75b   :  { %795 = vadd.xlane.f32.xlu1 %v794_v17 }
 0x7e8   :  { %v796_v18 = vpop.xlane.xlu1 %795 }
 0x7e9   :  { %v798_v19 = vmul.f32 0.03125, %v796_v18 }
 0x7eb   :  { %v799_v20 = vsub.f32 %v791_v12, %v798_v19 }
 0x7ed   :  { %v800_v21 = vmul.f32 %v799_v20, %v799_v20 }
 0x7ef   :  { %v801_v22 = vsel %vm497_vm13, %v800_v21, 0.0 }
 0x7f0   :  { %802 = vadd.xlane.f32.xlu0 %v801_v22 }
 0x87d   :  { %v803_v28 = vpop.xlane.xlu0 %802 }
 0x87e   :  { %v804_v29 = vmul.f32 0.03125, %v803_v28 }
 0x880   :  { %v805_v30 = vadd.f32 1e-05, %v804_v29 }
 0x882   :  { %1087 = vrsqrt.f32 %v805_v30 }
 0x88c   :  { %v1088_v31 = vpop.eup %1087 }
 0x88d   :  { %v807_v2 = vmul.f32 %v1088_v31, %v799_v20 }
 0x88f   :  { %v814_v34 = vmul.f32 %v933_v32, %v807_v2 }
 0x891   :  { %v821_v35 = vadd.f32 %v934_v33, %v814_v34 }
 0x893   :  { %1004 = vmatmul.mubr.msk.f32.vlgmr.msra.gmra.mrb[12].mxu1 %vm497_vm13, %v821_v35 }
 0x966   :  { %v902_v37 = vpop.f32.mrb[12].mxu1 }
 0x967   :  { %v903_v38 = vadd.f32 %v935_v36, %v902_v37  ;;  %v1005_v39 = vpop.f32.mrb[13].mxu1 }
 0x969   :  { %906 = vst.msk [vmem:[%s1447_s20] sm:$0xff] %vm172_vm5, %v903_v38 }

// kernel: _forward_impl.2
= control target key start
LH: loop header
LB: loop body
LE: loop exit
PB: predicated region body
PF: predicated region fallthrough
CT: control target
= control target key end

     0   :  { %vm60_vm0 = vcmask 1042432   ;;  %v1953_v0 = vmov 0   ;;  %v1954_v2 = vmov 0.0   ;;  %vm56_vm1 = vcmask 23552   ;;  %s2701_s3 = inlined_call_operand.vmem [shape: s32[8,2], index: 3, kind: input, shape index: {}]   ;;  %s2702_s1 = inlined_call_operand.vmem [shape: f32[3,96], index: 1, kind: input, shape index: {}]   ;;  %s2703_s0 = inlined_call_operand.vmem [shape: f32[8,3], index: 0, kind: input, shape index: {}]   ;;  %s2704_s4 = inlined_call_operand.vmem [shape: f32[2,16,32], index: 4, kind: input, shape index: {}]   ;;  %s2705_s5 = inlined_call_operand.vmem [shape: f32[1,4], index: 5, kind: input, shape index: {}]   ;;  %s2706_s6 = inlined_call_operand.vmem [shape: f32[160,320], index: 6, kind: input, shape index: {}]   ;;  %s2707_s10 = inlined_call_operand.vmem [shape: f32[320,10], index: 10, kind: input, shape index: {}]   ;;  %s2708_s2 = inlined_call_operand.vmem [shape: f32[1,96], index: 2, kind: input, shape index: {}]   ;;  %s2709_s7 = inlined_call_operand.vmem [shape: f32[1,320], index: 7, kind: input, shape index: {}]   ;;  %s2710_s11 = inlined_call_operand.vmem [shape: f32[10,320], index: 11, kind: input, shape index: {}]   ;;  %s2711_s12 = inlined_call_operand.vmem [shape: f32[320,10], index: 12, kind: input, shape index: {}]   ;;  %s2712_s8 = inlined_call_operand.vmem [shape: f32[1,320], index: 8, kind: input, shape index: {}]   ;;  %s2713_s9 = inlined_call_operand.vmem [shape: f32[1,320], index: 9, kind: input, shape index: {}]   ;;  %s2714_s13 = inlined_call_operand.vmem [shape: f32[1,10], index: 13, kind: input, shape index: {}]   ;;  %s2715_s14 = inlined_call_operand.vmem [shape: f32[8,10], index: 14, kind: output, shape index: {}]  }
   0x1   :  { %1944 = vset.pattern.permute.xlu0 %v1953_v0  ;;  %v153_v1 = vld [vmem:[%s2701_s3] sm:$0xff]  ;;  %1616 = vmatprep.subr.mxu0 %v1954_v2  ;;  %v161_v6 = vld [vmem:[%s2704_s4 + $0x8] sm:$0xff]  ;;  %vm1955_vm2 = vmmov 0   ;;  %v1956_v7 = vmov 0.0|0.0   ;;  %v1957_v9 = vmov 1   ;;  %v1958_v11 = vmov 2  }
   0x2   :  { %v48_v3 = vld [vmem:[%s2702_s1] sm:$0x7]  ;;  %155 = vperm.xlu0 %1944, %v153_v1   ;;  %1618 = vmatprep.mubr.msk.f32.mxu0 %vm1955_vm2, %v1954_v2  ;;  %v1959_v12 = vmov 3   ;;  %v151_v13 = vlaneseq  ;;  %v1451_v15 = vld [vmem:[%s2704_s4 + $0x10] sm:$0xff]  ;;  %v1452_v16 = vld [vmem:[%s2704_s4 + $0x18] sm:$0xff]  ;;  %vm162_vm3 = vcmask 130048  }
   0x3   :  { %v47_v4 = vld [vmem:[%s2703_s0] sm:$0xff]  ;;  %1617 = vmatpush3.msk.msra.mxu0 %vm60_vm0, %v48_v3  ;;  %1946 = vset.pattern.permute.xlu1 %v1958_v11  ;;  %v1710_v18 = vpack.c.bf16 %v1452_v16, %v1451_v15  ;;  %v341_v28 = vld [vmem:[%s2706_s6 + $0x8] sm:$0xff]  ;;  %v343_v32 = vld [vmem:[%s2706_s6 + $0x18] sm:$0xff]  ;;  %vm322_vm6 = vcmask 261120   ;;  %vm338_vm7 = vcmask 785408   ;;  %vm603_vm8 = vcmask 523264  }
   0x4   :  { %v160_v5 = vld [vmem:[%s2704_s4] sm:$0xff]  ;;  %1706 = vmatprep.subr.bf16.mxu0 %v1956_v7  ;;  %1619 = vmatmul.mubr.msk.f32.vlgmr.msra.gmra.mrb[0].mxu0 %vm56_vm1, %v47_v4  ;;  %v152_v14 = vand.u32 127, %v151_v13  ;;  %s1960_s4 = smov 32   ;;  %v342_v33 = vld [vmem:[%s2706_s6 + $0x10] sm:$0xff]  ;;  %v345_v34 = vld [vmem:[%s2706_s6 + $0x28] sm:$0xff]  ;;  %vm908_vm9 = vcmask 1041408  }
   0x5   :  { %v1707_v8 = vpack.c.bf16 %v161_v6, %v160_v5  ;;  %1625 = vmatprep.mubr.msk.f32.mxu0 %vm1955_vm2, %v1954_v2  ;;  %v1447_v10 = vld [vmem:[%s2705_s5] ss:$0 sm:$0xff]  ;;  %v1753_v36 = vpack.c.bf16 %v345_v34, %v342_v33  ;;  %v347_v37 = vld [vmem:[%s2706_s6 + $0x38] sm:$0xff]  ;;  %v350_v38 = vld [vmem:[%s2706_s6 + $0x50] sm:$0xff]  ;;  %vm1962_vm10 = vmmov 1   ;;  %vm904_vm12 = vcmask 80896  }
   0x6   :  { %1945 = vset.pattern.permute.xlu0 %v1957_v9  ;;  %325 = vperm.xlu1 %1946, %v1447_v10   ;;  %v344_v29 = vld [vmem:[%s2706_s6 + $0x20] sm:$0xff]  ;;  %v346_v39 = vld [vmem:[%s2706_s6 + $0x30] sm:$0xff]  ;;  %v1716_v40 = vpack.c.bf16 %v350_v38, %v347_v37  ;;  %v349_v41 = vld [vmem:[%s2706_s6 + $0x48] sm:$0xff] }
   0x7   :  { %1708 = vmatpush3.bf16.msra.mxu0 %v1707_v8  ;;  %237 = vperm.xlu0 %1945, %v153_v1   ;;  %v340_v30 = vld [vmem:[%s2706_s6] sm:$0xff]  ;;  %v1712_v31 = vpack.c.bf16 %v344_v29, %v341_v28  ;;  %v351_v43 = vld [vmem:[%s2706_s6 + $0x58] sm:$0xff]  ;;  %v1718_v44 = vpack.c.bf16 %v349_v41, %v346_v39  ;;  %v353_v46 = vld [vmem:[%s2706_s6 + $0x68] sm:$0xff] }
   0x8   :  { %1709 = vmatprep.subr.bf16.mxu0 %v1956_v7  ;;  %v1714_v35 = vpack.c.bf16 %v343_v32, %v340_v30  ;;  %v348_v42 = vld [vmem:[%s2706_s6 + $0x40] sm:$0xff]  ;;  %v355_v50 = vld [vmem:[%s2706_s6 + $0x78] sm:$0xff]  ;;  %v354_v51 = vld [vmem:[%s2706_s6 + $0x70] sm:$0xff] }
   0x9   :  { %1713 = vmatprep.subr.bf16.mxu1 %v1712_v31  ;;  %v1756_v45 = vpack.c.bf16 %v351_v43, %v348_v42  ;;  %v356_v47 = vld [vmem:[%s2706_s6 + $0x80] sm:$0xff]  ;;  %v357_v52 = vld [vmem:[%s2706_s6 + $0x88] sm:$0xff]  ;;  %v359_v53 = vld [vmem:[%s2706_s6 + $0x98] sm:$0xff] }
   0xa   :  { %1947 = vset.pattern.permute.xlu1 %v1959_v12  ;;  %1715 = vmatpush1.bf16.msra.mxu1 %v1714_v35  ;;  %v352_v48 = vld [vmem:[%s2706_s6 + $0x60] sm:$0xff]  ;;  %v1720_v49 = vpack.c.bf16 %v356_v47, %v353_v46  ;;  %v362_v54 = vld [vmem:[%s2706_s6 + $0xb0] sm:$0xff]  ;;  %v1759_v56 = vpack.c.bf16 %v357_v52, %v354_v51  ;;  %v361_v59 = vld [vmem:[%s2706_s6 + $0xa8] sm:$0xff] }
   0xb   :  { %1948 = vset.pattern.permute.xlu0 %v1953_v0  ;;  %330 = vperm.xlu1 %1947, %v1447_v10   ;;  %v1722_v55 = vpack.c.bf16 %v355_v50, %v352_v48  ;;  %v358_v57 = vld [vmem:[%s2706_s6 + $0x90] sm:$0xff]  ;;  %v1724_v58 = vpack.c.bf16 %v362_v54, %v359_v53  ;;  %v360_v60 = vld [vmem:[%s2706_s6 + $0xa0] sm:$0xff]  ;;  %v363_v61 = vld [vmem:[%s2706_s6 + $0xb8] sm:$0xff] }
   0xc   :  { %142 = vperm.xlu0 %1948, %v1447_v10   ;;  %1717 = vmatprep.subr.bf16.mxu1 %v1716_v40  ;;  %v365_v62 = vld [vmem:[%s2706_s6 + $0xc8] sm:$0xff]  ;;  %v368_v63 = vld [vmem:[%s2706_s6 + $0xe0] sm:$0xff]  ;;  %v1726_v0 = vpack.c.bf16 %v361_v59, %v358_v57  ;;  %v1762_v1 = vpack.c.bf16 %v363_v61, %v360_v60  ;;  %v367_v5 = vld [vmem:[%s2706_s6 + $0xd8] sm:$0xff] }
   0xd   :  { %v364_v3 = vld [vmem:[%s2706_s6 + $0xc0] sm:$0xff]  ;;  %v1728_v4 = vpack.c.bf16 %v368_v63, %v365_v62  ;;  %v366_v6 = vld [vmem:[%s2706_s6 + $0xd0] sm:$0xff]  ;;  %v369_v8 = vld [vmem:[%s2706_s6 + $0xe8] sm:$0xff] }
   0xe   :  { %1719 = vmatpush1.bf16.msra.mxu1 %v1718_v44  ;;  %v1730_v11 = vpack.c.bf16 %v367_v5, %v364_v3  ;;  %v373_v16 = vld [vmem:[%s2706_s6 + $0x108] sm:$0xff]  ;;  %v378_v28 = vld [vmem:[%s2706_s6 + $0x130] sm:$0xff]  ;;  %v383_v30 = vld [vmem:[%s2706_s6 + $0x158] sm:$0xff] }
   0xf   :  { %1949 = vset.pattern.permute.xlu1 %v1957_v9  ;;  %1721 = vmatprep.subr.bf16.mxu1 %v1720_v49  ;;  %v371_v9 = vld [vmem:[%s2706_s6 + $0xf8] sm:$0xff]  ;;  %v381_v29 = vld [vmem:[%s2706_s6 + $0x148] sm:$0xff]  ;;  %v386_v31 = vld [vmem:[%s2706_s6 + $0x170] sm:$0xff] }
  0x10   :  { %1950 = vset.pattern.permute.xlu0 %v1959_v12  ;;  %v1765_v12 = vpack.c.bf16 %v369_v8, %v366_v6  ;;  %v1771_v33 = vpack.c.bf16 %v381_v29, %v378_v28  ;;  %v382_v34 = vld [vmem:[%s2706_s6 + $0x150] sm:$0xff]  ;;  %v1740_v35 = vpack.c.bf16 %v386_v31, %v383_v30  ;;  %v384_v37 = vld [vmem:[%s2706_s6 + $0x160] sm:$0xff]  ;;  %v387_v38 = vld [vmem:[%s2706_s6 + $0x178] sm:$0xff] }
  0x11   :  { %v389_v39 = vld [vmem:[%s2706_s6 + $0x188] sm:$0xff]  ;;  %v392_v40 = vld [vmem:[%s2706_s6 + $0x1a0] sm:$0xff]  ;;  %v1774_v42 = vpack.c.bf16 %v387_v38, %v384_v37  ;;  %v390_v46 = vld [vmem:[%s2706_s6 + $0x190] sm:$0xff] }
  0x12   :  { %1723 = vmatpush1.bf16.msra.mxu1 %v1722_v55  ;;  %v388_v43 = vld [vmem:[%s2706_s6 + $0x180] sm:$0xff]  ;;  %v1744_v44 = vpack.c.bf16 %v392_v40, %v389_v39  ;;  %v393_v47 = vld [vmem:[%s2706_s6 + $0x1a8] sm:$0xff]  ;;  %v395_v48 = vld [vmem:[%s2706_s6 + $0x1b8] sm:$0xff] }
  0x13   :  { %1725 = vmatprep.subr.bf16.mxu1 %v1724_v58  ;;  %v398_v49 = vld [vmem:[%s2706_s6 + $0x1d0] sm:$0xff]  ;;  %v1777_v51 = vpack.c.bf16 %v393_v47, %v390_v46  ;;  %v397_v54 = vld [vmem:[%s2706_s6 + $0x1c8] sm:$0xff]  ;;  %v396_v55 = vld [vmem:[%s2706_s6 + $0x1c0] sm:$0xff] }
  0x14   :  { %v394_v52 = vld [vmem:[%s2706_s6 + $0x1b0] sm:$0xff]  ;;  %v1748_v53 = vpack.c.bf16 %v398_v49, %v395_v48  ;;  %v579_v61 = vld [vmem:[%s2707_s10 + $0x80] sm:$0xff]  ;;  %v580_v62 = vld [vmem:[%s2707_s10 + $0x88] sm:$0xff] }
  0x15   :  { %v1750_v57 = vpack.c.bf16 %v397_v54, %v394_v52  ;;  %v2275_v63 = vpack.c.bf16 %v580_v62, %v579_v61  ;;  %v1444_v5 = vld [vmem:[%s2708_s2] ss:$0 sm:$0xff]  ;;  %v584_v30 = vld [vmem:[%s2707_s10 + $0xa8] sm:$0xff]  ;;  %v585_v38 = vld [vmem:[%s2707_s10 + $0xb0] sm:$0xff] }
  0x16   :  { %1727 = vmatpush1.bf16.msra.mxu1 %v1726_v0  ;;  %v583_v29 = vld [vmem:[%s2707_s10 + $0xa0] sm:$0xff]  ;;  %v600_v37 = vld [vmem:[%s2707_s10 + $0x128] sm:$0xff]  ;;  %v586_v39 = vld [vmem:[%s2707_s10 + $0xb8] sm:$0xff] }
  0x17   :  { %1729 = vmatprep.subr.bf16.mxu1 %v1728_v4  ;;  %v588_v46 = vld [vmem:[%s2707_s10 + $0xc8] sm:$0xff]  ;;  %v571_v49 = vld [vmem:[%s2707_s10 + $0x40] sm:$0xff]  ;;  %v590_v52 = vld [vmem:[%s2707_s10 + $0xd8] sm:$0xff] }
  0x18   :  { %v575_v61 = vld [vmem:[%s2707_s10 + $0x60] sm:$0xff]  ;;  %v576_v62 = vld [vmem:[%s2707_s10 + $0x68] sm:$0xff]  ;;  %vm2520_vm11 = vmpackc.low %vm908_vm9, %vm1962_vm10 }
  0x1a   :  { %1731 = vmatpush1.bf16.msra.mxu1 %v1730_v11 }
  0x81   :  { %v156_v17 = vpop.permute.xlu0 %155 }
  0x82   :  { %vm157_vm4 = vcmp.eq.s32.totalorder %v152_v14, %v156_v17  ;;  %v372_v17 = vld [vmem:[%s2706_s6 + $0x100] sm:$0xff] }
  0x83   :  { %v1448_v19 = vsel %vm157_vm4, 1.0, %v1954_v2 }
  0x84   :  { %1626 = vmatmul.mubr.msk.f32.vlgmr.msra.gmra.mrb[2].mxu0 %vm162_vm3, %v1448_v19  ;;  %v377_v19 = vld [vmem:[%s2706_s6 + $0x128] sm:$0xff] }
  0x85   :  { %1711 = vmatpush3.bf16.msra.mxu0 %v1710_v18  ;;  %1632 = vmatprep.mubr.msk.f32.mxu0 %vm1955_vm2, %v1954_v2  ;;  %v375_v18 = vld [vmem:[%s2706_s6 + $0x118] sm:$0xff]  ;;  %v326_v59 = vpop.permute.xlu1 %325 }
  0x86   :  { %v238_v20 = vpop.permute.xlu0 %237  ;;  %1752 = vmatprep.subr.bf16.mxu0 %v1956_v7 }
  0x87   :  { %vm239_vm5 = vcmp.eq.s32.totalorder %v152_v14, %v238_v20  ;;  %v370_v14 = vld [vmem:[%s2706_s6 + $0xf0] sm:$0xff]  ;;  %v380_v20 = vld [vmem:[%s2706_s6 + $0x140] sm:$0xff] }
  0x88   :  { %v1450_v21 = vsel %vm239_vm5, 1.0, %v1954_v2 }
  0x89   :  { %1633 = vmatmul.mubr.msk.f32.vlgmr.msra.gmra.mrb[4].mxu0 %vm162_vm3, %v1450_v21  ;;  %v1734_v21 = vpack.c.bf16 %v373_v16, %v370_v14  ;;  %v596_v14 = vld [vmem:[%s2707_s10 + $0x108] sm:$0xff]  ;;  %v582_v16 = vld [vmem:[%s2707_s10 + $0x98] sm:$0xff] }
  0x8a   :  { %1754 = vmatpush1.bf16.msra.mxu0 %v1753_v36  ;;  %v385_v36 = vld [vmem:[%s2706_s6 + $0x168] sm:$0xff]  ;;  %v331_v60 = vpop.permute.xlu1 %330 }
  0x8b   :  { %1755 = vmatprep.subr.bf16.mxu0 %v1956_v7  ;;  %v1742_v41 = vpack.c.bf16 %v385_v36, %v382_v34  ;;  %v2338_v34 = vpack.c.bf16 %v584_v30, %v583_v29  ;;  %v599_v36 = vld [vmem:[%s2707_s10 + $0x120] sm:$0xff] }
  0x8e   :  { %1757 = vmatpush1.bf16.msra.mxu0 %v1756_v45  ;;  %v391_v45 = vld [vmem:[%s2706_s6 + $0x198] sm:$0xff] }
  0x8f   :  { %1758 = vmatprep.subr.bf16.mxu0 %v1956_v7  ;;  %v1746_v50 = vpack.c.bf16 %v391_v45, %v388_v43  ;;  %v569_v43 = vld [vmem:[%s2707_s10 + $0x30] sm:$0xff]  ;;  %v587_v45 = vld [vmem:[%s2707_s10 + $0xc0] sm:$0xff] }
  0x90   :  { %v2385_v48 = vpack.c.bf16 %v588_v46, %v587_v45 }
  0x92   :  { %1760 = vmatpush1.bf16.msra.mxu0 %v1759_v56  ;;  %v399_v56 = vld [vmem:[%s2706_s6 + $0x1d8] sm:$0xff] }
  0x93   :  { %1761 = vmatprep.subr.bf16.mxu0 %v1956_v7  ;;  %v1780_v58 = vpack.c.bf16 %v399_v56, %v396_v55  ;;  %v573_v55 = vld [vmem:[%s2707_s10 + $0x50] sm:$0xff]  ;;  %v574_v56 = vld [vmem:[%s2707_s10 + $0x58] sm:$0xff] }
  0x96   :  { %1763 = vmatpush1.bf16.msra.mxu0 %v1762_v1 }
  0x97   :  { %1764 = vmatprep.subr.bf16.mxu0 %v1956_v7 }
  0x9a   :  { %1766 = vmatpush1.bf16.msra.mxu0 %v1765_v12  ;;  %v595_v12 = vld [vmem:[%s2707_s10 + $0x100] sm:$0xff] }
  0x9b   :  { %1767 = vmatprep.subr.bf16.mxu0 %v1956_v7 }
  0xd7   :  { %v2075_v22 = vpop.f32.mrb[0].mxu0 }
  0xd8   :  { %v1620_v23 = vpop.f32.mrb[1].mxu0  ;;  %v131_v6 = vadd.f32 %v1444_v5, %v2075_v22  ;;  %v593_v5 = vld [vmem:[%s2707_s10 + $0xf0] sm:$0xff] }
  0xd9   :  { %v1768_v23 = vpack.c.bf16 %v375_v18, %v372_v17 }
  0xda   :  { %v134_v8 = vmax.f32 %v131_v6, 0.0  ;;  %v594_v6 = vld [vmem:[%s2707_s10 + $0xf8] sm:$0xff] }
  0xdb   :  { %1769 = vmatpush1.bf16.msra.mxu0 %v1768_v23 }
  0xdc   :  { %1770 = vmatprep.subr.bf16.mxu0 %v1956_v7 }
  0xdf   :  { %1772 = vmatpush1.bf16.msra.mxu0 %v1771_v33 }
  0xe0   :  { %1773 = vmatprep.subr.bf16.mxu0 %v1956_v7 }
  0xe3   :  { %1775 = vmatpush1.bf16.msra.mxu0 %v1774_v42  ;;  %v2365_v42 = vpack.c.bf16 %v586_v39, %v585_v38 }
  0xe4   :  { %1776 = vmatprep.subr.bf16.mxu0 %v1956_v7 }
  0xe7   :  { %1778 = vmatpush1.bf16.msra.mxu0 %v1777_v51  ;;  %v589_v51 = vld [vmem:[%s2707_s10 + $0xd0] sm:$0xff] }
  0xe8   :  { %1779 = vmatprep.subr.bf16.mxu0 %v1956_v7  ;;  %v2404_v54 = vpack.c.bf16 %v590_v52, %v589_v51 }
  0xeb   :  { %1781 = vmatpush1.bf16.msra.mxu0 %v1780_v58  ;;  %v592_v58 = vld [vmem:[%s2707_s10 + $0xe8] sm:$0xff] }
  0xec   :  { %1814 = vmatprep.subr.bf16.mxu0 %v1956_v7 }
 0x157   :  { %v2077_v24 = vpop.f32.mrb[2].mxu0 }
 0x158   :  { %v1627_v25 = vpop.f32.mrb[3].mxu0 }
 0x159   :  { %v376_v25 = vld [vmem:[%s2706_s6 + $0x120] sm:$0xff] }
 0x15c   :  { %v314_v26 = vpop.f32.mrb[4].mxu0 }
 0x15d   :  { %319 = vrot.lane.b32.xlu1 %v314_v26, %s1960_s4  ;;  %v1634_v27 = vpop.f32.mrb[5].mxu0  ;;  %v1736_v26 = vpack.c.bf16 %v380_v20, %v377_v19  ;;  %v565_v19 = vld [vmem:[%s2707_s10 + $0x10] sm:$0xff]  ;;  %v2307_v20 = vpack.c.bf16 %v596_v14, %v595_v12 }
 0x15e   :  { %v379_v27 = vld [vmem:[%s2706_s6 + $0x138] sm:$0xff] }
 0x15f   :  { %v1738_v32 = vpack.c.bf16 %v379_v27, %v376_v25  ;;  %v566_v25 = vld [vmem:[%s2707_s10 + $0x18] sm:$0xff] }
 0x160   :  { %v598_v27 = vld [vmem:[%s2707_s10 + $0x118] sm:$0xff]  ;;  %v2329_v31 = vpack.c.bf16 %v566_v25, %v565_v19 }
 0x161   :  { %147 = vperm.xlu1 %1949, %v1447_v10   ;;  %v374_v10 = vld [vmem:[%s2706_s6 + $0x110] sm:$0xff]  ;;  %s1961_s6 = smov 96  }
 0x162   :  { %v1732_v15 = vpack.c.bf16 %v374_v10, %v371_v9  ;;  %v143_v9 = vpop.permute.xlu0 %142  ;;  %v563_v10 = vld [vmem:[%s2707_s10] sm:$0xff] }
 0x163   :  { %v145_v22 = vsub.f32 %v134_v8, %v143_v9  ;;  %v1810_v8 = vpack.c.bf16 %v594_v6, %v593_v5  ;;  %v577_v9 = vld [vmem:[%s2707_s10 + $0x70] sm:$0xff]  ;;  %v1252_v6 = vld [vmem:[%s2711_s12 + $0x18] sm:$0xff] }
 0x164   :  { %1733 = vmatprep.subr.bf16.mxu1 %v1732_v15  ;;  %v581_v15 = vld [vmem:[%s2707_s10 + $0x90] sm:$0xff] }
 0x165   :  { %1735 = vmatpush1.bf16.msra.mxu1 %v1734_v21  ;;  %v2309_v23 = vpack.c.bf16 %v582_v16, %v581_v15  ;;  %v1251_v5 = vld [vmem:[%s2711_s12 + $0x10] sm:$0xff] }
 0x166   :  { %1737 = vmatprep.subr.bf16.mxu1 %v1736_v26  ;;  %v597_v26 = vld [vmem:[%s2707_s10 + $0x110] sm:$0xff] }
 0x167   :  { %v2335_v33 = vpack.c.bf16 %v598_v27, %v597_v26 }
 0x169   :  { %1739 = vmatpush1.bf16.msra.mxu1 %v1738_v32  ;;  %v567_v32 = vld [vmem:[%s2707_s10 + $0x20] sm:$0xff] }
 0x16a   :  { %1741 = vmatprep.subr.bf16.mxu1 %v1740_v35  ;;  %v568_v35 = vld [vmem:[%s2707_s10 + $0x28] sm:$0xff] }
 0x16b   :  { %v2359_v40 = vpack.c.bf16 %v568_v35, %v567_v32 }
 0x16d   :  { %1743 = vmatpush1.bf16.msra.mxu1 %v1742_v41  ;;  %v2362_v41 = vpack.c.bf16 %v600_v37, %v599_v36  ;;  %v901_v36 = vld [vmem:[%s2710_s11 + $0x18] sm:$0x3]  ;;  %v1275_v37 = vld [vmem:[%s2711_s12 + $0xd0] sm:$0xff] }
 0x16e   :  { %1745 = vmatprep.subr.bf16.mxu1 %v1744_v44  ;;  %v570_v44 = vld [vmem:[%s2707_s10 + $0x38] sm:$0xff] }
 0x16f   :  { %v2381_v47 = vpack.c.bf16 %v570_v44, %v569_v43  ;;  %v903_v43 = vld [vmem:[%s2710_s11 + $0x28] sm:$0x3] }
 0x171   :  { %1747 = vmatpush1.bf16.msra.mxu1 %v1746_v50  ;;  %v572_v50 = vld [vmem:[%s2707_s10 + $0x48] sm:$0xff] }
 0x172   :  { %1749 = vmatprep.subr.bf16.mxu1 %v1748_v53  ;;  %v2401_v53 = vpack.c.bf16 %v572_v50, %v571_v49 }
 0x175   :  { %1751 = vmatpush1.bf16.msra.mxu1 %v1750_v57  ;;  %v591_v57 = vld [vmem:[%s2707_s10 + $0xe0] sm:$0xff] }
 0x176   :  { %1783 = vmatprep.subr.bf16.mxu1 %v2275_v63 }
 0x1cf   :  { %v320_v0 = vpop.permute.xlu1 %319 }
 0x1d0   :  { %v323_v1 = vsel %vm322_vm6, %v2077_v24, %v320_v0  ;;  %v564_v24 = vld [vmem:[%s2707_s10 + $0x8] sm:$0xff]  ;;  %v2431_v0 = vpack.c.bf16 %v576_v62, %v575_v61  ;;  %v1249_v61 = vld [vmem:[%s2711_s12] sm:$0xff] }
 0x1d1   :  { %v328_v3 = vsub.f32 %v323_v1, %v326_v59  ;;  %v2302_v18 = vpack.c.bf16 %v564_v24, %v563_v10  ;;  %v2419_v59 = vpack.c.bf16 %v574_v56, %v573_v55  ;;  %v601_v1 = vld [vmem:[%s2707_s10 + $0x130] sm:$0xff]  ;;  %v578_v10 = vld [vmem:[%s2707_s10 + $0x78] sm:$0xff]  ;;  %v403_v24 = vshrl.u32 %v151_v13, 7 }
 0x1d3   :  { %v333_v4 = vmul.f32 %v331_v60, %v328_v3  ;;  %v2422_v60 = vpack.c.bf16 %v592_v58, %v591_v57  ;;  %v602_v3 = vld [vmem:[%s2707_s10 + $0x138] sm:$0xff]  ;;  %v2456_v12 = vsub.s32 0, %v403_v24  ;;  %v2458_v14 = vsub.s32 2, %v403_v24 }
 0x1d4   :  { %v2463_v15 = vsub.s32 1, %v403_v24 }
 0x1d5   :  { %335 = vrot.lane.b32.xlu1 %v333_v4, %s1961_s6  ;;  %v1824_v4 = vpack.c.bf16 %v602_v3, %v601_v1  ;;  %v1268_v1 = vld [vmem:[%s2711_s12 + $0x98] sm:$0xff] }
 0x1e0   :  { %v148_v11 = vpop.permute.xlu1 %147 }
 0x1e1   :  { %v150_v17 = vmul.f32 %v148_v11, %v145_v22  ;;  %v1812_v11 = vpack.c.bf16 %v578_v10, %v577_v9  ;;  %v400_v22 = vld [vmem:[%s2709_s7] sm:$0x7]  ;;  %v1270_v9 = vld [vmem:[%s2711_s12 + $0xa8] sm:$0xff]  ;;  %v1896_v10 = vpack.c.bf16 %v1252_v6, %v1251_v5 }
 0x1e2   :  { %v405_v16 = vrot.slane %v400_v22, %v2456_v12 }
 0x247   :  { %v336_v21 = vpop.permute.xlu1 %335 }
 0x248   :  { %1454 = vmatprep.mubr.msk.f32.mxu1 %vm322_vm6, %v336_v21  ;;  %1455 = vmatprep.mubr.msk.f32.mxu0 %vm322_vm6, %v336_v21  ;;  %v339_v28 = vsel %vm338_vm7, %v150_v17, %v336_v21  ;;  %v413_v17 = vrot.slane %v400_v22, %v2458_v14 }
 0x249   :  { %484 = vmatmul.mubr.f32.vlgmr.msra.gmra.mrb[0].mxu1 %v339_v28  ;;  %555 = vmatmul.mubr.f32.vlgmr.msra.gmra.mrb[6].mxu0 %v339_v28 }
 0x24a   :  { %1785 = vmatpush3.bf16.msra.mxu1 %v2302_v18  ;;  %1816 = vmatpush3.bf16.msra.mxu0 %v2307_v20 }
 0x24b   :  { %1787 = vmatprep.subr.bf16.mxu1 %v2309_v23  ;;  %1817 = vmatprep.subr.bf16.mxu0 %v1956_v7 }
 0x24c   :  { %1651 = vmatprep.mubr.msk.f32.mxu0 %vm1955_vm2, %v1954_v2 }
 0x24e   :  { %1789 = vmatpush3.bf16.msra.mxu1 %v2329_v31  ;;  %1819 = vmatpush3.bf16.msra.mxu0 %v2335_v33 }
 0x24f   :  { %1791 = vmatprep.subr.bf16.mxu1 %v2338_v34  ;;  %1820 = vmatprep.subr.bf16.mxu0 %v1956_v7 }
 0x252   :  { %1793 = vmatpush3.bf16.msra.mxu1 %v2359_v40  ;;  %1822 = vmatpush3.bf16.msra.mxu0 %v2362_v41 }
 0x253   :  { %1795 = vmatprep.subr.bf16.mxu1 %v2365_v42  ;;  %1823 = vmatprep.subr.bf16.mxu0 %v1956_v7 }
 0x256   :  { %1797 = vmatpush3.bf16.msra.mxu1 %v2381_v47  ;;  %1825 = vmatpush3.bf16.msra.mxu0 %v1824_v4 }
 0x257   :  { %1799 = vmatprep.subr.bf16.mxu1 %v2385_v48  ;;  %1827 = vmatprep.subr.bf16.mxu0 %v2275_v63  ;;  %v409_v63 = vrot.slane %v400_v22, %v2463_v15  ;;  %v1254_v22 = vld [vmem:[%s2711_s12 + $0x28] sm:$0xff] }
 0x25a   :  { %1801 = vmatpush3.bf16.msra.mxu1 %v2401_v53 }
 0x25b   :  { %1803 = vmatprep.subr.bf16.mxu1 %v2404_v54 }
 0x25e   :  { %1805 = vmatpush3.bf16.msra.mxu1 %v2419_v59 }
 0x25f   :  { %1807 = vmatprep.subr.bf16.mxu1 %v2422_v60 }
 0x262   :  { %1809 = vmatpush3.bf16.msra.mxu1 %v2431_v0 }
 0x263   :  { %1811 = vmatprep.subr.bf16.mxu1 %v1810_v8 }
 0x266   :  { %1813 = vmatpush3.bf16.msra.mxu1 %v1812_v11 }
 0x267   :  { %1858 = vmatprep.subr.bf16.mxu1 %v1956_v7 }
 0x31c   :  { %v485_v19 = vpop.f32.mrb[0].mxu1  ;;  %v556_v21 = vpop.f32.mrb[6].mxu0 }
 0x31d   :  { %v486_v25 = vadd.f32 %v485_v19, %v405_v16  ;;  %v557_v13 = vadd.f32 %v556_v21, %v413_v17  ;;  %v487_v26 = vpop.f32.mrb[1].mxu1  ;;  %v558_v27 = vpop.f32.mrb[7].mxu0  ;;  %v1281_v16 = vld [vmem:[%s2711_s12 + $0x100] sm:$0xff]  ;;  %v1282_v17 = vld [vmem:[%s2711_s12 + $0x108] sm:$0xff]  ;;  %v1272_v19 = vld [vmem:[%s2711_s12 + $0xb8] sm:$0xff] }
 0x31e   :  { %v488_v28 = vadd.f32 %v487_v26, %v409_v63  ;;  %v1271_v63 = vld [vmem:[%s2711_s12 + $0xb0] sm:$0xff]  ;;  %v1923_v21 = vpack.c.bf16 %v1282_v17, %v1281_v16 }
 0x31f   :  { %v2468_v29 = vmax.f32 %v557_v13, 0.0  ;;  %v2472_v32 = vmax.f32 %v486_v25, 0.0  ;;  %v1283_v25 = vld [vmem:[%s2711_s12 + $0x110] sm:$0xff]  ;;  %v1284_v13 = vld [vmem:[%s2711_s12 + $0x118] sm:$0xff] }
 0x320   :  { %v2470_v30 = vmax.f32 %v488_v28, 0.0  ;;  %v1926_v27 = vpack.c.bf16 %v1284_v13, %v1283_v25  ;;  %v1902_v28 = vpack.c.bf16 %v1272_v19, %v1271_v63 }
 0x321   :  { %1652 = vmatmul.mubr.msk.f32.vlgmr.msra.gmra.mrb[8].mxu0 %vm603_vm8, %v2468_v29 }
 0x322   :  { %1829 = vmatpush3.bf16.msra.mxu0 %v2302_v18  ;;  %671 = vmatprep.mubr.f32.mxu1 %v2470_v30  ;;  %v748_v35 = vmul.f32 %v2470_v30, %v2470_v30  ;;  %v749_v18 = vmul.f32 %v2468_v29, %v2468_v29 }
 0x323   :  { %672 = vmatmul.mubr.f32.vlgmr.msra.gmra.mrb[2].mxu1 %v2472_v32  ;;  %1831 = vmatprep.subr.bf16.mxu0 %v2309_v23  ;;  %v899_v23 = vld [vmem:[%s2710_s11 + $0x8] sm:$0xff] }
 0x324   :  { %1860 = vmatpush3.bf16.msra.mxu1 %v2307_v20  ;;  %817 = vmatprep.mubr.f32.mxu0 %v748_v35  ;;  %v747_v20 = vmul.f32 %v2472_v32, %v2472_v32  ;;  %v1255_v35 = vld [vmem:[%s2711_s12 + $0x30] sm:$0xff] }
 0x325   :  { %1861 = vmatprep.subr.bf16.mxu1 %v1956_v7  ;;  %1670 = vmatprep.mubr.msk.f32.mxu1 %vm1955_vm2, %v1954_v2 }
 0x326   :  { %1833 = vmatpush3.bf16.msra.mxu0 %v2329_v31  ;;  %v902_v31 = vld [vmem:[%s2710_s11 + $0x20] sm:$0x3] }
 0x327   :  { %1835 = vmatprep.subr.bf16.mxu0 %v2338_v34  ;;  %v898_v34 = vld [vmem:[%s2710_s11] sm:$0xff] }
 0x328   :  { %1863 = vmatpush3.bf16.msra.mxu1 %v2335_v33  ;;  %v1870_v33 = vpack.c.bf16 %v902_v31, %v899_v23  ;;  %v1873_v38 = vpack.c.bf16 %v901_v36, %v898_v34  ;;  %v1274_v23 = vld [vmem:[%s2711_s12 + $0xc8] sm:$0xff]  ;;  %v1257_v34 = vld [vmem:[%s2711_s12 + $0x40] sm:$0xff] }
 0x329   :  { %1864 = vmatprep.subr.bf16.mxu1 %v1956_v7  ;;  %v1258_v36 = vld [vmem:[%s2711_s12 + $0x48] sm:$0xff] }
 0x32a   :  { %1837 = vmatpush3.bf16.msra.mxu0 %v2359_v40 }
 0x32b   :  { %1839 = vmatprep.subr.bf16.mxu0 %v2365_v42  ;;  %v900_v42 = vld [vmem:[%s2710_s11 + $0x10] sm:$0xff] }
 0x32c   :  { %1866 = vmatpush3.bf16.msra.mxu1 %v2362_v41  ;;  %v1877_v46 = vpack.c.bf16 %v903_v43, %v900_v42  ;;  %v1260_v42 = vld [vmem:[%s2711_s12 + $0x58] sm:$0xff] }
 0x32d   :  { %1867 = vmatprep.subr.bf16.mxu1 %v1956_v7 }
 0x32e   :  { %1841 = vmatpush3.bf16.msra.mxu0 %v2381_v47 }
 0x32f   :  { %1843 = vmatprep.subr.bf16.mxu0 %v2385_v48 }
 0x330   :  { %1869 = vmatpush3.bf16.msra.mxu1 %v1824_v4 }
 0x331   :  { %1882 = vmatprep.subr.msk.bf16.mxu1 %vm2520_vm11, %v1870_v33 }
 0x332   :  { %1845 = vmatpush3.bf16.msra.mxu0 %v2401_v53 }
 0x333   :  { %1671 = vmatmul.mubr.msk.f32.vlgmr.msra.gmra.mrb[4].mxu1 %vm603_vm8, %v749_v18  ;;  %1847 = vmatprep.subr.bf16.mxu0 %v2404_v54  ;;  %v1256_v18 = vld [vmem:[%s2711_s12 + $0x38] sm:$0xff] }
 0x334   :  { %1126 = vmatprep.mubr.f32.mxu1 %v1954_v2  ;;  %1885 = vmatpush1.bf16.msk.msra.mxu1 %vm2520_vm11, %v1873_v38  ;;  %v1904_v31 = vpack.c.bf16 %v1256_v18, %v1255_v35 }
 0x336   :  { %1849 = vmatpush3.bf16.msra.mxu0 %v2419_v59  ;;  %v1265_v59 = vld [vmem:[%s2711_s12 + $0x80] sm:$0xff] }
 0x337   :  { %1851 = vmatprep.subr.bf16.mxu0 %v2422_v60  ;;  %v1266_v60 = vld [vmem:[%s2711_s12 + $0x88] sm:$0xff] }
 0x338   :  { %v1890_v62 = vpack.c.bf16 %v1266_v60, %v1265_v59  ;;  %v1264_v59 = vld [vmem:[%s2711_s12 + $0x78] sm:$0xff] }
 0x33a   :  { %1853 = vmatpush3.bf16.msra.mxu0 %v2431_v0  ;;  %v1250_v0 = vld [vmem:[%s2711_s12 + $0x8] sm:$0xff]  ;;  %1891 = vmatprep.subr.bf16.mxu1 %v1890_v62 }
 0x33b   :  { %1855 = vmatprep.subr.bf16.mxu0 %v1810_v8  ;;  %v1892_v3 = vpack.c.bf16 %v1250_v0, %v1249_v61  ;;  %v1269_v8 = vld [vmem:[%s2711_s12 + $0xa0] sm:$0xff] }
 0x33c   :  { %v1898_v24 = vpack.c.bf16 %v1270_v9, %v1269_v8 }
 0x33e   :  { %1857 = vmatpush3.bf16.msra.mxu0 %v1812_v11  ;;  %v1253_v11 = vld [vmem:[%s2711_s12 + $0x20] sm:$0xff] }
 0x33f   :  { %1872 = vmatprep.subr.msk.bf16.mxu0 %vm2520_vm11, %v1870_v33  ;;  %v1900_v26 = vpack.c.bf16 %v1254_v22, %v1253_v11 }
 0x341   :  { %818 = vmatmul.mubr.f32.vlgmr.msra.gmra.mrb[10].mxu0 %v747_v20  ;;  %v1273_v20 = vld [vmem:[%s2711_s12 + $0xc0] sm:$0xff] }
 0x342   :  { %982 = vmatprep.mubr.f32.mxu0 %v1954_v2  ;;  %1875 = vmatpush1.bf16.msk.msra.mxu0 %vm2520_vm11, %v1873_v38  ;;  %v1906_v33 = vpack.c.bf16 %v1274_v23, %v1273_v20  ;;  %v1276_v38 = vld [vmem:[%s2711_s12 + $0xd8] sm:$0xff]  ;;  %v1468_v20 = vld [vmem:[%s2714_s13] ss:$0 sm:$0xff] }
 0x343   :  { %1876 = vmatprep.subr.bf16.mxu0 %v1956_v7 }
 0x3f4   :  { %v743_v39 = vpop.f32.mrb[8].mxu0 }
 0x3f5   :  { %v1653_v40 = vpop.f32.mrb[9].mxu0 }
 0x3f6   :  { %v1510_v41 = vpop.f32.mrb[2].mxu1  ;;  %v1910_v40 = vpack.c.bf16 %v1276_v38, %v1275_v37 }
 0x3f7   :  { %v1511_v44 = vpop.f32.mrb[3].mxu1 }
 0x3f8   :  { %v1512_v45 = vadd.f32 %v1511_v44, %v1510_v41  ;;  %v1259_v41 = vld [vmem:[%s2711_s12 + $0x50] sm:$0xff]  ;;  %v1285_v44 = vld [vmem:[%s2711_s12 + $0x120] sm:$0xff] }
 0x3f9   :  { %v1912_v43 = vpack.c.bf16 %v1260_v42, %v1259_v41 }
 0x3fa   :  { %v744_v47 = vadd.f32 %v1512_v45, %v743_v39  ;;  %v1908_v39 = vpack.c.bf16 %v1258_v36, %v1257_v34  ;;  %v1286_v45 = vld [vmem:[%s2711_s12 + $0x128] sm:$0xff] }
 0x3fc   :  { %1460 = vmatmul.mubr.msk.f32.vlgmr.msra.gmra.mrb[12].mxu0 %vm904_vm12, %v744_v47  ;;  %v893_v54 = vmul.f32 %v744_v47, %v744_v47 }
 0x3fd   :  { %1879 = vmatpush3.bf16.msk.msra.mxu0 %vm2520_vm11, %v1877_v46  ;;  %1677 = vmatprep.mubr.msk.f32.mxu0 %vm1955_vm2, %v1954_v2 }
 0x3fe   :  { %1886 = vmatprep.subr.bf16.mxu0 %v1956_v7 }
 0x400   :  { %1678 = vmatmul.mubr.msk.f32.vlgmr.msra.gmra.mrb[14].mxu0 %vm904_vm12, %v744_v47  ;;  %v1277_v47 = vld [vmem:[%s2711_s12 + $0xe0] sm:$0xff] }
 0x401   :  { %1889 = vmatpush3.bf16.msk.msra.mxu0 %vm2520_vm11, %v1877_v46  ;;  %1684 = vmatprep.mubr.msk.f32.mxu0 %vm1955_vm2, %v1954_v2  ;;  %v1929_v46 = vpack.c.bf16 %v1286_v45, %v1285_v44 }
 0x402   :  { %1922 = vmatprep.subr.bf16.mxu0 %v1956_v7 }
 0x406   :  { %v889_v48 = vpop.f32.mrb[4].mxu1 }
 0x407   :  { %v1672_v49 = vpop.f32.mrb[5].mxu1 }
 0x414   :  { %v1554_v50 = vpop.f32.mrb[10].mxu0 }
 0x415   :  { %v1555_v51 = vpop.f32.mrb[11].mxu0 }
 0x416   :  { %v1556_v52 = vadd.f32 %v1555_v51, %v1554_v50  ;;  %v1261_v50 = vld [vmem:[%s2711_s12 + $0x60] sm:$0xff]  ;;  %v1262_v51 = vld [vmem:[%s2711_s12 + $0x68] sm:$0xff] }
 0x418   :  { %v890_v53 = vadd.f32 %v1556_v52, %v889_v48  ;;  %v1278_v48 = vld [vmem:[%s2711_s12 + $0xe8] sm:$0xff]  ;;  %v1916_v52 = vpack.c.bf16 %v1262_v51, %v1261_v50 }
 0x419   :  { %v1914_v49 = vpack.c.bf16 %v1278_v48, %v1277_v47 }
 0x41a   :  { %v894_v55 = vsub.f32 %v890_v53, %v893_v54  ;;  %v1287_v53 = vld [vmem:[%s2711_s12 + $0x130] sm:$0xff]  ;;  %v1288_v54 = vld [vmem:[%s2711_s12 + $0x138] sm:$0xff] }
 0x41c   :  { %v895_v56 = vmax.f32 %v894_v55, 0.0  ;;  %v1932_v55 = vpack.c.bf16 %v1288_v54, %v1287_v53 }
 0x41e   :  { %v896_v57 = vadd.f32 1e-05, %v895_v56  ;;  %v1279_v56 = vld [vmem:[%s2711_s12 + $0xf0] sm:$0xff] }
 0x420   :  { %1951 = vrsqrt.f32 %v896_v57  ;;  %v1280_v57 = vld [vmem:[%s2711_s12 + $0xf8] sm:$0xff] }
 0x42a   :  { %v1952_v58 = vpop.eup %1951 }
 0x42b   :  { %1465 = vmatmul.mubr.msk.f32.vlgmr.msra.gmra.mrb[6].mxu1 %vm904_vm12, %v1952_v58  ;;  %1685 = vmatmul.mubr.msk.f32.vlgmr.msra.gmra.mrb[16].mxu0 %vm904_vm12, %v1952_v58  ;;  %v1918_v58 = vpack.c.bf16 %v1280_v57, %v1279_v56 }
 0x42c   :  { %1703 = vmatprep.mubr.msk.f32.mxu0 %vm1955_vm2, %v1954_v2  ;;  %v1267_v2 = vld [vmem:[%s2711_s12 + $0x90] sm:$0xff]  ;;  %1893 = vmatpush3.bf16.msra.mxu1 %v1892_v3  ;;  %v1229_v3 = vld [vmem:[%s2713_s9] sm:$0x7] }
 0x42d   :  { %v1894_v4 = vpack.c.bf16 %v1268_v1, %v1267_v2  ;;  %1924 = vmatpush3.bf16.msra.mxu0 %v1923_v21  ;;  %v1209_v1 = vld [vmem:[%s2712_s8] sm:$0x7]  ;;  %v1242_v17 = vrot.slane %v1229_v3, %v2458_v14  ;;  %v1234_v25 = vrot.slane %v1229_v3, %v2456_v12 }
 0x42e   :  { %1925 = vmatprep.subr.bf16.mxu0 %v1956_v7  ;;  %v1214_v6 = vrot.slane %v1209_v1, %v2456_v12  ;;  %v1222_v8 = vrot.slane %v1209_v1, %v2458_v14 }
 0x42f   :  { %1895 = vmatprep.subr.bf16.mxu1 %v1894_v4 }
 0x430   :  { %1897 = vmatpush3.bf16.msra.mxu1 %v1896_v10 }
 0x431   :  { %1899 = vmatprep.subr.bf16.mxu1 %v1898_v24  ;;  %1927 = vmatpush3.bf16.msra.mxu0 %v1926_v27  ;;  %v1218_v24 = vrot.slane %v1209_v1, %v2463_v15 }
 0x432   :  { %1928 = vmatprep.subr.bf16.mxu0 %v1956_v7 }
 0x434   :  { %1901 = vmatpush3.bf16.msra.mxu1 %v1900_v26 }
 0x435   :  { %1903 = vmatprep.subr.bf16.mxu1 %v1902_v28  ;;  %1930 = vmatpush3.bf16.msra.mxu0 %v1929_v46 }
 0x436   :  { %1931 = vmatprep.subr.bf16.mxu0 %v1956_v7  ;;  %v1263_v7 = vld [vmem:[%s2711_s12 + $0x70] sm:$0xff] }
 0x437   :  { %v1920_v60 = vpack.c.bf16 %v1264_v59, %v1263_v7 }
 0x438   :  { %1905 = vmatpush3.bf16.msra.mxu1 %v1904_v31 }
 0x439   :  { %1907 = vmatprep.subr.bf16.mxu1 %v1906_v33  ;;  %1933 = vmatpush3.bf16.msra.mxu0 %v1932_v55 }
 0x43c   :  { %1909 = vmatpush3.bf16.msra.mxu1 %v1908_v39 }
 0x43d   :  { %1911 = vmatprep.subr.bf16.mxu1 %v1910_v40 }
 0x440   :  { %1913 = vmatpush3.bf16.msra.mxu1 %v1912_v43 }
 0x441   :  { %1915 = vmatprep.subr.bf16.mxu1 %v1914_v49 }
 0x444   :  { %1917 = vmatpush3.bf16.msra.mxu1 %v1916_v52 }
 0x445   :  { %1919 = vmatprep.subr.bf16.mxu1 %v1918_v58 }
 0x448   :  { %1921 = vmatpush3.bf16.msra.mxu1 %v1920_v60 }
 0x4cf   :  { %v984_v61 = vpop.f32.mrb[12].mxu0 }
 0x4d0   :  { %v986_v62 = vpop.f32.mrb[13].mxu0  ;;  %v1203_v4 = vsub.f32 %v2472_v32, %v984_v61  ;;  %v1238_v32 = vrot.slane %v1229_v3, %v2463_v15 }
 0x4d1   :  { %v1204_v9 = vsub.f32 %v2470_v30, %v986_v62 }
 0x4d3   :  { %v1055_v0 = vpop.f32.mrb[14].mxu0 }
 0x4d4   :  { %v1679_v2 = vpop.f32.mrb[15].mxu0  ;;  %v1205_v5 = vsub.f32 %v2468_v29, %v1055_v0 }
 0x4fe   :  { %v1128_v10 = vpop.f32.mrb[6].mxu1  ;;  %v1199_v11 = vpop.f32.mrb[16].mxu0 }
 0x4ff   :  { %v1206_v22 = vmul.f32 %v1203_v4, %v1128_v10  ;;  %v1208_v16 = vmul.f32 %v1205_v5, %v1199_v11  ;;  %v1130_v63 = vpop.f32.mrb[7].mxu1  ;;  %v1686_v19 = vpop.f32.mrb[17].mxu0 }
 0x500   :  { %v1207_v21 = vmul.f32 %v1204_v9, %v1130_v63 }
 0x501   :  { %v1226_v29 = vmul.f32 %v1214_v6, %v1206_v22  ;;  %v1228_v13 = vmul.f32 %v1222_v8, %v1208_v16 }
 0x502   :  { %v1227_v26 = vmul.f32 %v1218_v24, %v1207_v21 }
 0x503   :  { %v1248_v27 = vadd.f32 %v1242_v17, %v1228_v13  ;;  %v1246_v28 = vadd.f32 %v1234_v25, %v1226_v29 }
 0x504   :  { %v1247_v30 = vadd.f32 %v1238_v32, %v1227_v26 }
 0x505   :  { %1704 = vmatmul.mubr.msk.f32.vlgmr.msra.gmra.mrb[18].mxu0 %vm603_vm8, %v1248_v27 }
 0x506   :  { %1363 = vmatprep.mubr.f32.mxu1 %v1247_v30 }
 0x507   :  { %1364 = vmatmul.mubr.f32.vlgmr.msra.gmra.mrb[8].mxu1 %v1246_v28 }
 0x5d8   :  { %v1435_v35 = vpop.f32.mrb[18].mxu0 }
 0x5d9   :  { %v1705_v18 = vpop.f32.mrb[19].mxu0 }
 0x5da   :  { %v1604_v14 = vpop.f32.mrb[8].mxu1 }
 0x5db   :  { %v1605_v15 = vpop.f32.mrb[9].mxu1 }
 0x5dc   :  { %v1606_v23 = vadd.f32 %v1605_v15, %v1604_v14 }
 0x5de   :  { %v1366_v31 = vadd.f32 %v1606_v23, %v1468_v20 }
 0x5e0   :  { %v1436_v12 = vadd.f32 %v1435_v35, %v1366_v31 }
 0x5e2   :  { %1439 = vst.msk [vmem:[%s2715_s14] sm:$0xff] %vm904_vm12, %v1436_v12 }

</bundles_post_ra>
